<compile_context>
chip_gen: v7x
topology: tpu7x:2x2x1
jax: 0.10.0
libtpu: 0.0.40
codegen_flags: <defaults>
</compile_context>

<pallas_src>
import functools

import jax
import jax.numpy as jnp
from jax import lax
from jax.experimental import pallas as pl
from jax.experimental.pallas import tpu as pltpu

NUM_CLASSES = 21
NEG_POS_RATIO = 3


def ssd_loss_kernel(tri_ref, conf_ref, label_ref, lp_ref, lt_ref, out_ref,
                    *, neg_pos_ratio):
    bt, C, P = conf_ref.shape

    # Loop-invariant small constants, hoisted out of the per-element loop
    # (JAX does not CSE broadcast_in_dim).
    ones_lhs = jnp.ones((8, P), dtype=jnp.float32)               # MXU reduction operand
    cls_iota = lax.broadcasted_iota(jnp.int32, (C, P), 0)        # class id per sublane

    def one_element(i, carry):
        sl1_acc, npos_acc, ce_acc, cnt_acc = carry

        conf = conf_ref[i]          # (C, P) f32 — P lane-dense
        label = label_ref[i]        # (1, P) i32
        lp = lp_ref[i]              # (4, P) f32
        lt = lt_ref[i]              # (4, P) f32

        # ---- log-softmax over the class (sublane) axis ----
        m = jnp.max(conf, axis=0, keepdims=True)                              # (1, P)
        lse = jnp.log(jnp.sum(jnp.exp(conf - m), axis=0, keepdims=True)) + m  # (1, P)
        logsm = conf - lse                                                    # (C, P)

        pos = label > 0                                                       # (1, P)
        pos_f = pos.astype(jnp.float32)
        num_pos = jnp.sum(pos_f, axis=1, keepdims=True)                       # (1, 1)
        num_neg = num_pos * jnp.float32(neg_pos_ratio)                        # (1, 1)

        # ---- hard negative mining ----
        # Background loss -log_softmax[0] = lse - conf[0] is always >= 0, so
        # the -1e30 sentinel keeps positives strictly last in the descending
        # order. (Do not add offsets/margins to `mining` without revisiting.)
        bg = lse - conf[0:1, :]                                               # (1, P)
        mining = jnp.where(pos, jnp.float32(-1e30), bg)                       # (1, P)

        # (P, P) matrix whose (k, j) entry is mining[k] (varies along sublanes):
        # one sublane broadcast + one tile-aligned f32 transpose.
        mining_k = jnp.transpose(jnp.broadcast_to(mining, (P, P)))            # (P, P)

        # Stable descending rank:
        #   rank_j = #{k: l_k > l_j} + #{k: l_k == l_j and k < j}
        gt = mining_k > mining                                                # (P, P)
        eq = mining_k == mining                                               # (P, P)
        cmp = jnp.where(eq, tri_ref[...], gt.astype(jnp.float32))             # (P, P) f32
        # Sublane-reduce cmp on the MXU (frees XLU/VALU): (8,P) @ (P,P).
        rank = jnp.dot(ones_lhs, cmp,
                       preferred_element_type=jnp.float32)[0:1, :]            # (1, P)

        sel_f = jnp.logical_or(pos, rank < num_neg).astype(jnp.float32)       # (1, P)

        # ---- classification cross-entropy over selected priors ----
        onehot = (cls_iota == label).astype(jnp.float32)                      # (C, P)
        ce_per = -jnp.sum(onehot * logsm, axis=0, keepdims=True)              # (1, P)
        ce_acc = ce_acc + jnp.sum(sel_f * ce_per, axis=1, keepdims=True)
        cnt_acc = cnt_acc + jnp.sum(sel_f, axis=1, keepdims=True)

        # ---- smooth L1 (beta = 1.0, reduction = sum) on positive locations ----
        d = lp - lt
        ad = jnp.abs(d)
        sl = jnp.where(ad < 1.0, 0.5 * d * d, ad - 0.5)                       # (4, P)
        sl_per = jnp.sum(sl, axis=0, keepdims=True)                           # (1, P)
        sl1_acc = sl1_acc + jnp.sum(pos_f * sl_per, axis=1, keepdims=True)
        npos_acc = npos_acc + num_pos

        return sl1_acc, npos_acc, ce_acc, cnt_acc

    zero = jnp.zeros((1, 1), jnp.float32)
    sl1, npos, cesum, cecnt = lax.fori_loop(
        0, bt, one_element, (zero, zero, zero, zero), unroll=True)

    # Single lane-dense writeback: lanes 0..3 carry the four partial sums.
    lane = lax.broadcasted_iota(jnp.int32, (1, 128), 1)
    row = (jnp.where(lane == 0, sl1, 0.0)
           + jnp.where(lane == 1, npos, 0.0)
           + jnp.where(lane == 2, cesum, 0.0)
           + jnp.where(lane == 3, cecnt, 0.0))
    out_ref[0] = jnp.broadcast_to(row, (8, 128))


def ssd_loss_pallas(conf_pred, loca_pred, label_true, loca_true,
                    *, neg_pos_ratio=NEG_POS_RATIO, batch_tile=None):
    B, P, C = conf_pred.shape
    if batch_tile is None:
        batch_tile = min(4, B)        # amortize per-grid-step overhead
    bt = int(batch_tile)
    G = -(-B // bt)                   # cdiv
    B_pad = G * bt

    # Host-side layout plumbing: make the prior axis P lane-dense.
    conf_t = jnp.transpose(conf_pred.astype(jnp.float32), (0, 2, 1))   # (B, C, P)
    lp_t = jnp.transpose(loca_pred.astype(jnp.float32), (0, 2, 1))     # (B, 4, P)
    lt_t = jnp.transpose(loca_true.astype(jnp.float32), (0, 2, 1))     # (B, 4, P)
    lab = label_true.astype(jnp.int32)[:, None, :]                     # (B, 1, P)

    if B_pad != B:
        # Zero padding is inert: label 0 -> no positives, no selected priors,
        # so padded elements contribute nothing to any partial sum.
        pad = ((0, B_pad - B), (0, 0), (0, 0))
        conf_t = jnp.pad(conf_t, pad)
        lp_t = jnp.pad(lp_t, pad)
        lt_t = jnp.pad(lt_t, pad)
        lab = jnp.pad(lab, pad)

    # Grid-invariant strict-upper-triangular (k < j) tie-break mask.
    tri = jnp.triu(jnp.ones((P, P), dtype=jnp.float32), 1)

    kernel = functools.partial(ssd_loss_kernel, neg_pos_ratio=neg_pos_ratio)

    partials = pl.pallas_call(
        kernel,
        out_shape=jax.ShapeDtypeStruct((G, 8, 128), jnp.float32),
        grid=(G,),
        in_specs=[
            pl.BlockSpec((P, P), lambda g: (0, 0)),        # cached across steps
            pl.BlockSpec((bt, C, P), lambda g: (g, 0, 0)),
            pl.BlockSpec((bt, 1, P), lambda g: (g, 0, 0)),
            pl.BlockSpec((bt, 4, P), lambda g: (g, 0, 0)),
            pl.BlockSpec((bt, 4, P), lambda g: (g, 0, 0)),
        ],
        out_specs=pl.BlockSpec((1, 8, 128), lambda g: (g, 0, 0)),
        compiler_params=pltpu.CompilerParams(
            dimension_semantics=("parallel",)),
    )(tri, conf_t, lab, lp_t, lt_t)

    sums = jnp.sum(partials[:, 0, :4], axis=0)          # (4,)
    sl1_sum, num_pos, ce_sum, sel_cnt = sums[0], sums[1], sums[2], sums[3]
    # Note: like the PyTorch reference, this yields NaN/Inf if a batch has
    # zero positive priors (no guard, for semantic parity).
    smooth_l1_loss = sl1_sum / num_pos
    classification_loss = (ce_sum / sel_cnt) / num_pos
    return smooth_l1_loss, classification_loss


def ssd_loss_ref(conf_pred, loca_pred, label_true, loca_true,
                 neg_pos_ratio=NEG_POS_RATIO):
    """Pure-JAX reference mirroring the PyTorch SSDLoss.forward semantics."""
    logsm = jax.nn.log_softmax(conf_pred, axis=2)
    bg = -logsm[:, :, 0]
    pos = label_true > 0
    num_pos_row = jnp.sum(pos, axis=1, keepdims=True)
    num_neg = num_pos_row * neg_pos_ratio
    mining = jnp.where(pos, -jnp.inf, bg)
    order = jnp.argsort(-mining, axis=1)          # descending, stable
    rank = jnp.argsort(order, axis=1)
    neg_mask = rank < num_neg
    mask = pos | neg_mask
    ce = -jnp.take_along_axis(logsm, label_true[..., None].astype(jnp.int32),
                              axis=2)[..., 0]
    cls_loss = jnp.sum(jnp.where(mask, ce, 0.0)) / jnp.sum(mask)
    d = loca_pred - loca_true
    ad = jnp.abs(d)
    sl = jnp.where(ad < 1.0, 0.5 * d * d, ad - 0.5)
    sl1 = jnp.sum(jnp.where(pos[..., None], sl, 0.0))
    n = jnp.sum(pos)
    return sl1 / n, cls_loss / n


if __name__ == "__main__":
    B, P, C = 2, 256, NUM_CLASSES
    key = jax.random.PRNGKey(0)
    k1, k2, k3, k4, k5 = jax.random.split(key, 5)

    conf_pred = jax.random.normal(k1, (B, P, C), dtype=jnp.float32)
    loca_pred = jax.random.normal(k2, (B, P, 4), dtype=jnp.float32)
    loca_true = jax.random.normal(k3, (B, P, 4), dtype=jnp.float32)

    # ~15% positive priors with classes 1..20, rest background (0).
    is_pos = jax.random.uniform(k4, (B, P)) < 0.15
    cls = jax.random.randint(k5, (B, P), 1, C, dtype=jnp.int32)
    label_true = jnp.where(is_pos, cls, 0).astype(jnp.int32)
    label_true = label_true.at[0, 0].set(5)       # guarantee >= 1 positive

    # TODO(synk): priors / iou_threshold / variances are unused in forward();
    # kept only for parity with the module's __init__.
    priors = jnp.zeros((P, 4), dtype=jnp.float32)
    iou_threshold, center_variance, size_variance = 0.5, 0.1, 0.2

    sl1_loss, cls_loss = ssd_loss_pallas(conf_pred, loca_pred, label_true, loca_true)
    sl1_loss, cls_loss = jax.block_until_ready((sl1_loss, cls_loss))

    ref_sl1, ref_cls = ssd_loss_ref(conf_pred, loca_pred, label_true, loca_true)
    assert jnp.allclose(sl1_loss, ref_sl1, rtol=1e-4, atol=1e-5), (sl1_loss, ref_sl1)
    assert jnp.allclose(cls_loss, ref_cls, rtol=1e-4, atol=1e-5), (cls_loss, ref_cls)

    print("KERNEL_OK")
</pallas_src>

<mosaic_0001>
module attributes {stable_mosaic.version = 11 : i64} {
  func.func @ssd_loss_kernel(%arg0: i32, %arg1: memref<256x256xf32, #tpu.memory_space<vmem>>, %arg2: memref<2x21x256xf32, #tpu.memory_space<vmem>>, %arg3: memref<2x1x256xi32, #tpu.memory_space<vmem>>, %arg4: memref<2x4x256xf32, #tpu.memory_space<vmem>>, %arg5: memref<2x4x256xf32, #tpu.memory_space<vmem>>, %arg6: memref<1x8x128xf32, #tpu.memory_space<vmem>>) attributes {dimension_semantics = [#tpu.dimension_semantics<parallel>], iteration_bounds = array<i64: 1>, scalar_prefetch = 0 : i64, scratch_operands = 0 : i64, tpu.core_type = #tpu.core_type<tc>, window_params = [{pipeline_mode = #tpu.pipeline_mode<synchronous>, transform_indices = @transform_0, window_bounds = array<i64: 256, 256>}, {transform_indices = @transform_1, window_bounds = array<i64: 2, 21, 256>}, {transform_indices = @transform_2, window_bounds = array<i64: 2, 1, 256>}, {transform_indices = @transform_3, window_bounds = array<i64: 2, 4, 256>}, {transform_indices = @transform_4, window_bounds = array<i64: 2, 4, 256>}, {transform_indices = @transform_5, window_bounds = array<i64: 1, 8, 128>}]} {
    %cst = arith.constant 1.000000e+00 : f32
    %0 = vector.broadcast %cst : f32 to vector<8x256xf32>
    %1 = tpu.iota {dimensions = array<i32: 0>} : vector<21x256xi32>
    %cst_0 = arith.constant 0.000000e+00 : f32
    %2 = vector.broadcast %cst_0 : f32 to vector<1x1xf32>
    %c0_i32 = arith.constant 0 : i32
    %3 = arith.index_cast %c0_i32 : i32 to index
    %c0 = arith.constant 0 : index
    %c0_1 = arith.constant 0 : index
    %4 = vector.load %arg2[%3, %c0, %c0_1] : memref<2x21x256xf32, #tpu.memory_space<vmem>>, vector<1x21x256xf32>
    %5 = vector.shape_cast %4 : vector<1x21x256xf32> to vector<21x256xf32>
    %6 = arith.index_cast %c0_i32 : i32 to index
    %c0_2 = arith.constant 0 : index
    %c0_3 = arith.constant 0 : index
    %7 = vector.load %arg3[%6, %c0_2, %c0_3] : memref<2x1x256xi32, #tpu.memory_space<vmem>>, vector<1x1x256xi32>
    %8 = vector.shape_cast %7 : vector<1x1x256xi32> to vector<1x256xi32>
    %9 = arith.index_cast %c0_i32 : i32 to index
    %c0_4 = arith.constant 0 : index
    %c0_5 = arith.constant 0 : index
    %10 = vector.load %arg4[%9, %c0_4, %c0_5] : memref<2x4x256xf32, #tpu.memory_space<vmem>>, vector<1x4x256xf32>
    %11 = vector.shape_cast %10 : vector<1x4x256xf32> to vector<4x256xf32>
    %12 = arith.index_cast %c0_i32 : i32 to index
    %c0_6 = arith.constant 0 : index
    %c0_7 = arith.constant 0 : index
    %13 = vector.load %arg5[%12, %c0_6, %c0_7] : memref<2x4x256xf32, #tpu.memory_space<vmem>>, vector<1x4x256xf32>
    %14 = vector.shape_cast %13 : vector<1x4x256xf32> to vector<4x256xf32>
    %cst_8 = arith.constant dense<0xFF800000> : vector<256xf32>
    %15 = vector.multi_reduction <maximumf>, %5, %cst_8 [0] : vector<21x256xf32> to vector<256xf32>
    %16 = vector.shape_cast %15 : vector<256xf32> to vector<1x256xf32>
    %17 = vector.broadcast %16 : vector<1x256xf32> to vector<21x256xf32>
    %18 = arith.subf %5, %17 : vector<21x256xf32>
    %19 = math.exp %18 : vector<21x256xf32>
    %cst_9 = arith.constant dense<0.000000e+00> : vector<256xf32>
    %20 = vector.multi_reduction <add>, %19, %cst_9 [0] : vector<21x256xf32> to vector<256xf32>
    %21 = vector.shape_cast %20 : vector<256xf32> to vector<1x256xf32>
    %22 = math.log %21 : vector<1x256xf32>
    %23 = arith.addf %22, %16 : vector<1x256xf32>
    %24 = vector.broadcast %23 : vector<1x256xf32> to vector<21x256xf32>
    %25 = arith.subf %5, %24 : vector<21x256xf32>
    %c0_i32_10 = arith.constant 0 : i32
    %26 = vector.broadcast %c0_i32_10 : i32 to vector<1x256xi32>
    %27 = arith.cmpi sgt, %8, %26 : vector<1x256xi32>
    %28 = arith.extui %27 : vector<1x256xi1> to vector<1x256xi32>
    %29 = arith.sitofp %28 : vector<1x256xi32> to vector<1x256xf32>
    %cst_11 = arith.constant dense<0.000000e+00> : vector<1xf32>
    %30 = vector.multi_reduction <add>, %29, %cst_11 [1] : vector<1x256xf32> to vector<1xf32>
    %31 = vector.shape_cast %30 : vector<1xf32> to vector<1x1xf32>
    %cst_12 = arith.constant 3.000000e+00 : f32
    %32 = vector.broadcast %cst_12 : f32 to vector<1x1xf32>
    %33 = arith.mulf %31, %32 : vector<1x1xf32>
    %34 = vector.extract_strided_slice %5 {offsets = [0, 0], sizes = [1, 256], strides = [1, 1]} : vector<21x256xf32> to vector<1x256xf32>
    %35 = arith.subf %23, %34 : vector<1x256xf32>
    %cst_13 = arith.constant -1.000000e+30 : f32
    %36 = vector.broadcast %cst_13 : f32 to vector<1x256xf32>
    %37 = arith.select %27, %36, %35 : vector<1x256xi1>, vector<1x256xf32>
    %38 = vector.shape_cast %37 : vector<1x256xf32> to vector<1x256xf32>
    %39 = vector.broadcast %38 : vector<1x256xf32> to vector<256x256xf32>
    %40 = tpu.transpose %39, [1, 0] : vector<256x256xf32> -> vector<256x256xf32>
    %41 = vector.broadcast %37 : vector<1x256xf32> to vector<256x256xf32>
    %42 = arith.cmpf ogt, %40, %41 : vector<256x256xf32>
    %43 = vector.broadcast %37 : vector<1x256xf32> to vector<256x256xf32>
    %44 = arith.cmpf oeq, %40, %43 : vector<256x256xf32>
    %c0_14 = arith.constant 0 : index
    %c0_15 = arith.constant 0 : index
    %45 = vector.load %arg1[%c0_14, %c0_15] : memref<256x256xf32, #tpu.memory_space<vmem>>, vector<256x256xf32>
    %46 = arith.extui %42 : vector<256x256xi1> to vector<256x256xi32>
    %47 = arith.sitofp %46 : vector<256x256xi32> to vector<256x256xf32>
    %48 = arith.select %44, %45, %47 : vector<256x256xi1>, vector<256x256xf32>
    %cst_16 = arith.constant dense<0.000000e+00> : vector<8x256xf32>
    %49 = tpu.matmul %0, %48, %cst_16 {dimension_numbers = #tpu.dot_dimension_numbers<[1], [0], [0], [1], [0, 0, 1, 1], [], []>} : vector<8x256xf32>, vector<256x256xf32>, vector<8x256xf32> -> vector<8x256xf32>
    %50 = vector.extract_strided_slice %49 {offsets = [0, 0], sizes = [1, 256], strides = [1, 1]} : vector<8x256xf32> to vector<1x256xf32>
    %51 = vector.broadcast %33 : vector<1x1xf32> to vector<1x256xf32>
    %52 = arith.cmpf olt, %50, %51 : vector<1x256xf32>
    %53 = arith.ori %27, %52 : vector<1x256xi1>
    %54 = arith.extui %53 : vector<1x256xi1> to vector<1x256xi32>
    %55 = arith.sitofp %54 : vector<1x256xi32> to vector<1x256xf32>
    %56 = vector.broadcast %8 : vector<1x256xi32> to vector<21x256xi32>
    %57 = arith.cmpi eq, %1, %56 : vector<21x256xi32>
    %58 = arith.extui %57 : vector<21x256xi1> to vector<21x256xi32>
    %59 = arith.sitofp %58 : vector<21x256xi32> to vector<21x256xf32>
    %60 = arith.mulf %59, %25 : vector<21x256xf32>
    %cst_17 = arith.constant dense<0.000000e+00> : vector<256xf32>
    %61 = vector.multi_reduction <add>, %60, %cst_17 [0] : vector<21x256xf32> to vector<256xf32>
    %62 = vector.shape_cast %61 : vector<256xf32> to vector<1x256xf32>
    %cst_18 = arith.constant 0.000000e+00 : f32
    %63 = vector.broadcast %cst_18 : f32 to vector<1x256xf32>
    %64 = arith.subf %63, %62 : vector<1x256xf32>
    %65 = arith.mulf %55, %64 : vector<1x256xf32>
    %cst_19 = arith.constant dense<0.000000e+00> : vector<1xf32>
    %66 = vector.multi_reduction <add>, %65, %cst_19 [1] : vector<1x256xf32> to vector<1xf32>
    %67 = vector.shape_cast %66 : vector<1xf32> to vector<1x1xf32>
    %68 = arith.addf %2, %67 : vector<1x1xf32>
    %cst_20 = arith.constant dense<0.000000e+00> : vector<1xf32>
    %69 = vector.multi_reduction <add>, %55, %cst_20 [1] : vector<1x256xf32> to vector<1xf32>
    %70 = vector.shape_cast %69 : vector<1xf32> to vector<1x1xf32>
    %71 = arith.addf %2, %70 : vector<1x1xf32>
    %72 = arith.subf %11, %14 : vector<4x256xf32>
    %73 = math.absf %72 : vector<4x256xf32>
    %cst_21 = arith.constant 1.000000e+00 : f32
    %74 = vector.broadcast %cst_21 : f32 to vector<4x256xf32>
    %75 = arith.cmpf olt, %73, %74 : vector<4x256xf32>
    %cst_22 = arith.constant 5.000000e-01 : f32
    %76 = vector.broadcast %cst_22 : f32 to vector<4x256xf32>
    %77 = arith.mulf %76, %72 : vector<4x256xf32>
    %78 = arith.mulf %77, %72 : vector<4x256xf32>
    %cst_23 = arith.constant 5.000000e-01 : f32
    %79 = vector.broadcast %cst_23 : f32 to vector<4x256xf32>
    %80 = arith.subf %73, %79 : vector<4x256xf32>
    %81 = arith.select %75, %78, %80 : vector<4x256xi1>, vector<4x256xf32>
    %cst_24 = arith.constant dense<0.000000e+00> : vector<256xf32>
    %82 = vector.multi_reduction <add>, %81, %cst_24 [0] : vector<4x256xf32> to vector<256xf32>
    %83 = vector.shape_cast %82 : vector<256xf32> to vector<1x256xf32>
    %84 = arith.mulf %29, %83 : vector<1x256xf32>
    %cst_25 = arith.constant dense<0.000000e+00> : vector<1xf32>
    %85 = vector.multi_reduction <add>, %84, %cst_25 [1] : vector<1x256xf32> to vector<1xf32>
    %86 = vector.shape_cast %85 : vector<1xf32> to vector<1x1xf32>
    %87 = arith.addf %2, %86 : vector<1x1xf32>
    %88 = arith.addf %2, %31 : vector<1x1xf32>
    %c1_i32 = arith.constant 1 : i32
    %89 = arith.index_cast %c1_i32 : i32 to index
    %c0_26 = arith.constant 0 : index
    %c0_27 = arith.constant 0 : index
    %90 = vector.load %arg2[%89, %c0_26, %c0_27] : memref<2x21x256xf32, #tpu.memory_space<vmem>>, vector<1x21x256xf32>
    %91 = vector.shape_cast %90 : vector<1x21x256xf32> to vector<21x256xf32>
    %92 = arith.index_cast %c1_i32 : i32 to index
    %c0_28 = arith.constant 0 : index
    %c0_29 = arith.constant 0 : index
    %93 = vector.load %arg3[%92, %c0_28, %c0_29] : memref<2x1x256xi32, #tpu.memory_space<vmem>>, vector<1x1x256xi32>
    %94 = vector.shape_cast %93 : vector<1x1x256xi32> to vector<1x256xi32>
    %95 = arith.index_cast %c1_i32 : i32 to index
    %c0_30 = arith.constant 0 : index
    %c0_31 = arith.constant 0 : index
    %96 = vector.load %arg4[%95, %c0_30, %c0_31] : memref<2x4x256xf32, #tpu.memory_space<vmem>>, vector<1x4x256xf32>
    %97 = vector.shape_cast %96 : vector<1x4x256xf32> to vector<4x256xf32>
    %98 = arith.index_cast %c1_i32 : i32 to index
    %c0_32 = arith.constant 0 : index
    %c0_33 = arith.constant 0 : index
    %99 = vector.load %arg5[%98, %c0_32, %c0_33] : memref<2x4x256xf32, #tpu.memory_space<vmem>>, vector<1x4x256xf32>
    %100 = vector.shape_cast %99 : vector<1x4x256xf32> to vector<4x256xf32>
    %cst_34 = arith.constant dense<0xFF800000> : vector<256xf32>
    %101 = vector.multi_reduction <maximumf>, %91, %cst_34 [0] : vector<21x256xf32> to vector<256xf32>
    %102 = vector.shape_cast %101 : vector<256xf32> to vector<1x256xf32>
    %103 = vector.broadcast %102 : vector<1x256xf32> to vector<21x256xf32>
    %104 = arith.subf %91, %103 : vector<21x256xf32>
    %105 = math.exp %104 : vector<21x256xf32>
    %cst_35 = arith.constant dense<0.000000e+00> : vector<256xf32>
    %106 = vector.multi_reduction <add>, %105, %cst_35 [0] : vector<21x256xf32> to vector<256xf32>
    %107 = vector.shape_cast %106 : vector<256xf32> to vector<1x256xf32>
    %108 = math.log %107 : vector<1x256xf32>
    %109 = arith.addf %108, %102 : vector<1x256xf32>
    %110 = vector.broadcast %109 : vector<1x256xf32> to vector<21x256xf32>
    %111 = arith.subf %91, %110 : vector<21x256xf32>
    %c0_i32_36 = arith.constant 0 : i32
    %112 = vector.broadcast %c0_i32_36 : i32 to vector<1x256xi32>
    %113 = arith.cmpi sgt, %94, %112 : vector<1x256xi32>
    %114 = arith.extui %113 : vector<1x256xi1> to vector<1x256xi32>
    %115 = arith.sitofp %114 : vector<1x256xi32> to vector<1x256xf32>
    %cst_37 = arith.constant dense<0.000000e+00> : vector<1xf32>
    %116 = vector.multi_reduction <add>, %115, %cst_37 [1] : vector<1x256xf32> to vector<1xf32>
    %117 = vector.shape_cast %116 : vector<1xf32> to vector<1x1xf32>
    %cst_38 = arith.constant 3.000000e+00 : f32
    %118 = vector.broadcast %cst_38 : f32 to vector<1x1xf32>
    %119 = arith.mulf %117, %118 : vector<1x1xf32>
    %120 = vector.extract_strided_slice %91 {offsets = [0, 0], sizes = [1, 256], strides = [1, 1]} : vector<21x256xf32> to vector<1x256xf32>
    %121 = arith.subf %109, %120 : vector<1x256xf32>
    %cst_39 = arith.constant -1.000000e+30 : f32
    %122 = vector.broadcast %cst_39 : f32 to vector<1x256xf32>
    %123 = arith.select %113, %122, %121 : vector<1x256xi1>, vector<1x256xf32>
    %124 = vector.shape_cast %123 : vector<1x256xf32> to vector<1x256xf32>
    %125 = vector.broadcast %124 : vector<1x256xf32> to vector<256x256xf32>
    %126 = tpu.transpose %125, [1, 0] : vector<256x256xf32> -> vector<256x256xf32>
    %127 = vector.broadcast %123 : vector<1x256xf32> to vector<256x256xf32>
    %128 = arith.cmpf ogt, %126, %127 : vector<256x256xf32>
    %129 = vector.broadcast %123 : vector<1x256xf32> to vector<256x256xf32>
    %130 = arith.cmpf oeq, %126, %129 : vector<256x256xf32>
    %c0_40 = arith.constant 0 : index
    %c0_41 = arith.constant 0 : index
    %131 = vector.load %arg1[%c0_40, %c0_41] : memref<256x256xf32, #tpu.memory_space<vmem>>, vector<256x256xf32>
    %132 = arith.extui %128 : vector<256x256xi1> to vector<256x256xi32>
    %133 = arith.sitofp %132 : vector<256x256xi32> to vector<256x256xf32>
    %134 = arith.select %130, %131, %133 : vector<256x256xi1>, vector<256x256xf32>
    %cst_42 = arith.constant dense<0.000000e+00> : vector<8x256xf32>
    %135 = tpu.matmul %0, %134, %cst_42 {dimension_numbers = #tpu.dot_dimension_numbers<[1], [0], [0], [1], [0, 0, 1, 1], [], []>} : vector<8x256xf32>, vector<256x256xf32>, vector<8x256xf32> -> vector<8x256xf32>
    %136 = vector.extract_strided_slice %135 {offsets = [0, 0], sizes = [1, 256], strides = [1, 1]} : vector<8x256xf32> to vector<1x256xf32>
    %137 = vector.broadcast %119 : vector<1x1xf32> to vector<1x256xf32>
    %138 = arith.cmpf olt, %136, %137 : vector<1x256xf32>
    %139 = arith.ori %113, %138 : vector<1x256xi1>
    %140 = arith.extui %139 : vector<1x256xi1> to vector<1x256xi32>
    %141 = arith.sitofp %140 : vector<1x256xi32> to vector<1x256xf32>
    %142 = vector.broadcast %94 : vector<1x256xi32> to vector<21x256xi32>
    %143 = arith.cmpi eq, %1, %142 : vector<21x256xi32>
    %144 = arith.extui %143 : vector<21x256xi1> to vector<21x256xi32>
    %145 = arith.sitofp %144 : vector<21x256xi32> to vector<21x256xf32>
    %146 = arith.mulf %145, %111 : vector<21x256xf32>
    %cst_43 = arith.constant dense<0.000000e+00> : vector<256xf32>
    %147 = vector.multi_reduction <add>, %146, %cst_43 [0] : vector<21x256xf32> to vector<256xf32>
    %148 = vector.shape_cast %147 : vector<256xf32> to vector<1x256xf32>
    %cst_44 = arith.constant 0.000000e+00 : f32
    %149 = vector.broadcast %cst_44 : f32 to vector<1x256xf32>
    %150 = arith.subf %149, %148 : vector<1x256xf32>
    %151 = arith.mulf %141, %150 : vector<1x256xf32>
    %cst_45 = arith.constant dense<0.000000e+00> : vector<1xf32>
    %152 = vector.multi_reduction <add>, %151, %cst_45 [1] : vector<1x256xf32> to vector<1xf32>
    %153 = vector.shape_cast %152 : vector<1xf32> to vector<1x1xf32>
    %154 = arith.addf %68, %153 : vector<1x1xf32>
    %cst_46 = arith.constant dense<0.000000e+00> : vector<1xf32>
    %155 = vector.multi_reduction <add>, %141, %cst_46 [1] : vector<1x256xf32> to vector<1xf32>
    %156 = vector.shape_cast %155 : vector<1xf32> to vector<1x1xf32>
    %157 = arith.addf %71, %156 : vector<1x1xf32>
    %158 = arith.subf %97, %100 : vector<4x256xf32>
    %159 = math.absf %158 : vector<4x256xf32>
    %cst_47 = arith.constant 1.000000e+00 : f32
    %160 = vector.broadcast %cst_47 : f32 to vector<4x256xf32>
    %161 = arith.cmpf olt, %159, %160 : vector<4x256xf32>
    %cst_48 = arith.constant 5.000000e-01 : f32
    %162 = vector.broadcast %cst_48 : f32 to vector<4x256xf32>
    %163 = arith.mulf %162, %158 : vector<4x256xf32>
    %164 = arith.mulf %163, %158 : vector<4x256xf32>
    %cst_49 = arith.constant 5.000000e-01 : f32
    %165 = vector.broadcast %cst_49 : f32 to vector<4x256xf32>
    %166 = arith.subf %159, %165 : vector<4x256xf32>
    %167 = arith.select %161, %164, %166 : vector<4x256xi1>, vector<4x256xf32>
    %cst_50 = arith.constant dense<0.000000e+00> : vector<256xf32>
    %168 = vector.multi_reduction <add>, %167, %cst_50 [0] : vector<4x256xf32> to vector<256xf32>
    %169 = vector.shape_cast %168 : vector<256xf32> to vector<1x256xf32>
    %170 = arith.mulf %115, %169 : vector<1x256xf32>
    %cst_51 = arith.constant dense<0.000000e+00> : vector<1xf32>
    %171 = vector.multi_reduction <add>, %170, %cst_51 [1] : vector<1x256xf32> to vector<1xf32>
    %172 = vector.shape_cast %171 : vector<1xf32> to vector<1x1xf32>
    %173 = arith.addf %87, %172 : vector<1x1xf32>
    %174 = arith.addf %88, %117 : vector<1x1xf32>
    %c2_i32 = arith.constant 2 : i32
    %175 = tpu.iota {dimensions = array<i32: 1>} : vector<1x128xi32>
    %c0_i32_52 = arith.constant 0 : i32
    %176 = vector.broadcast %c0_i32_52 : i32 to vector<1x128xi32>
    %177 = arith.cmpi eq, %175, %176 : vector<1x128xi32>
    %cst_53 = arith.constant 0.000000e+00 : f32
    %178 = vector.shape_cast %173 : vector<1x1xf32> to vector<1x1xf32>
    %179 = vector.broadcast %178 : vector<1x1xf32> to vector<1x128xf32>
    %180 = vector.broadcast %cst_53 : f32 to vector<1x128xf32>
    %181 = arith.select %177, %179, %180 : vector<1x128xi1>, vector<1x128xf32>
    %c1_i32_54 = arith.constant 1 : i32
    %182 = vector.broadcast %c1_i32_54 : i32 to vector<1x128xi32>
    %183 = arith.cmpi eq, %175, %182 : vector<1x128xi32>
    %cst_55 = arith.constant 0.000000e+00 : f32
    %184 = vector.shape_cast %174 : vector<1x1xf32> to vector<1x1xf32>
    %185 = vector.broadcast %184 : vector<1x1xf32> to vector<1x128xf32>
    %186 = vector.broadcast %cst_55 : f32 to vector<1x128xf32>
    %187 = arith.select %183, %185, %186 : vector<1x128xi1>, vector<1x128xf32>
    %188 = arith.addf %181, %187 : vector<1x128xf32>
    %c2_i32_56 = arith.constant 2 : i32
    %189 = vector.broadcast %c2_i32_56 : i32 to vector<1x128xi32>
    %190 = arith.cmpi eq, %175, %189 : vector<1x128xi32>
    %cst_57 = arith.constant 0.000000e+00 : f32
    %191 = vector.shape_cast %154 : vector<1x1xf32> to vector<1x1xf32>
    %192 = vector.broadcast %191 : vector<1x1xf32> to vector<1x128xf32>
    %193 = vector.broadcast %cst_57 : f32 to vector<1x128xf32>
    %194 = arith.select %190, %192, %193 : vector<1x128xi1>, vector<1x128xf32>
    %195 = arith.addf %188, %194 : vector<1x128xf32>
    %c3_i32 = arith.constant 3 : i32
    %196 = vector.broadcast %c3_i32 : i32 to vector<1x128xi32>
    %197 = arith.cmpi eq, %175, %196 : vector<1x128xi32>
    %cst_58 = arith.constant 0.000000e+00 : f32
    %198 = vector.shape_cast %157 : vector<1x1xf32> to vector<1x1xf32>
    %199 = vector.broadcast %198 : vector<1x1xf32> to vector<1x128xf32>
    %200 = vector.broadcast %cst_58 : f32 to vector<1x128xf32>
    %201 = arith.select %197, %199, %200 : vector<1x128xi1>, vector<1x128xf32>
    %202 = arith.addf %195, %201 : vector<1x128xf32>
    %203 = vector.shape_cast %202 : vector<1x128xf32> to vector<1x128xf32>
    %204 = vector.broadcast %203 : vector<1x128xf32> to vector<8x128xf32>
    %c0_59 = arith.constant 0 : index
    %c0_60 = arith.constant 0 : index
    %c0_61 = arith.constant 0 : index
    %205 = vector.load %arg6[%c0_59, %c0_60, %c0_61] : memref<1x8x128xf32, #tpu.memory_space<vmem>>, vector<1x8x128xf32>
    %206 = vector.shape_cast %205 : vector<1x8x128xf32> to vector<8x128xf32>
    %207 = vector.shape_cast %204 : vector<8x128xf32> to vector<1x8x128xf32>
    tpu.vector_store %arg6[%c0_59, %c0_60, %c0_61], %207 {strides = array<i32>} : memref<1x8x128xf32, #tpu.memory_space<vmem>>, vector<1x8x128xf32>,
    return
  }
  func.func @transform_0(%arg0: i32) -> (i32, i32) {
    %c0_i32 = arith.constant 0 : i32
    %c0_i32_0 = arith.constant 0 : i32
    %c0_i32_1 = arith.constant 0 : i32
    return %c0_i32, %c0_i32_0 : i32, i32
  }
  func.func @transform_1(%arg0: i32) -> (i32, i32, i32) {
    %c0_i32 = arith.constant 0 : i32
    %c0_i32_0 = arith.constant 0 : i32
    %c0_i32_1 = arith.constant 0 : i32
    return %arg0, %c0_i32, %c0_i32_0 : i32, i32, i32
  }
  func.func @transform_2(%arg0: i32) -> (i32, i32, i32) {
    %c0_i32 = arith.constant 0 : i32
    %c0_i32_0 = arith.constant 0 : i32
    %c0_i32_1 = arith.constant 0 : i32
    return %arg0, %c0_i32, %c0_i32_0 : i32, i32, i32
  }
  func.func @transform_3(%arg0: i32) -> (i32, i32, i32) {
    %c0_i32 = arith.constant 0 : i32
    %c0_i32_0 = arith.constant 0 : i32
    %c0_i32_1 = arith.constant 0 : i32
    return %arg0, %c0_i32, %c0_i32_0 : i32, i32, i32
  }
  func.func @transform_4(%arg0: i32) -> (i32, i32, i32) {
    %c0_i32 = arith.constant 0 : i32
    %c0_i32_0 = arith.constant 0 : i32
    %c0_i32_1 = arith.constant 0 : i32
    return %arg0, %c0_i32, %c0_i32_0 : i32, i32, i32
  }
  func.func @transform_5(%arg0: i32) -> (i32, i32, i32) {
    %c0_i32 = arith.constant 0 : i32
    %c0_i32_0 = arith.constant 0 : i32
    %c0_i32_1 = arith.constant 0 : i32
    return %arg0, %c0_i32, %c0_i32_0 : i32, i32, i32
  }
}

</mosaic_0001>

<bundles_post_ra>
// kernel: tpu_custom_call.1
= control target key start
LH: loop header
LB: loop body
LE: loop exit
PB: predicated region body
PF: predicated region fallthrough
CT: control target
= control target key end

     0   :  { %10 = vsyncpa [#allocation3], 0  ;;  %s3707_s0 = inlined_call_operand.hbm [shape: f32[256,256], index: 0, kind: input, shape index: {}]   ;;  %s3708_s1 = inlined_call_operand.vmem [shape: f32[2,21,256], index: 1, kind: input, shape index: {}]   ;;  %s3709_s2 = inlined_call_operand.vmem [shape: s32[2,1,256], index: 2, kind: input, shape index: {}]   ;;  %s3710_s3 = inlined_call_operand.vmem [shape: f32[2,4,256], index: 3, kind: input, shape index: {}]   ;;  %s3711_s4 = inlined_call_operand.vmem [shape: f32[2,4,256], index: 4, kind: input, shape index: {}]   ;;  %s3712_s5 = inlined_call_operand.hbm [shape: f32[1,8,128], index: 5, kind: output, shape index: {}]  }
   0x1   :  { %11 = vsyncpa [#allocation4], 0  ;;  %s2070_s18 = smov [#allocation2]   ;;  %s2022_s22 = scalar_lea.hbm %s3707_s0, 8192 }
   0x2   :  { %s17_s19 = sshll.u32 %s2070_s18, 4  ;;  %p2023_p0 = scmp.ne.s32.totalorder %s3707_s0, %s2022_s22  ;;  %s18_s19 = int_to_ptr.vmem [resolvable:$true] %s17_s19 }
   0x3   :  { %p2026_p1 = scmp.lt.u32.totalorder %s2022_s22, %s3707_s0 }
   0x5   :  { %p2028_p2 = pnand %p2026_p1, %p2023_p0 }
   0x7   :  { %2031 = shalt.err (!%p2028_p2)
}
   0x8   :  { %s2032_s27 = scalar_lea.vmem %s18_s19, 8192  ;;  %p2037_p4 = scmp.lt.s32.totalorder %s18_s19, %s18_s19 }
   0x9   :  { %p2033_p3 = scmp.ne.s32.totalorder %s18_s19, %s2032_s27  ;;  %p2038_p5 = scmp.lt.s32.totalorder %s2032_s27, %s2032_s27 }
   0xb   :  { %p2039_p6 = por %p2038_p5, %p2037_p4 }
   0xd   :  { %p2040_p7 = pnand %p2039_p6, %p2033_p3 }
   0xf   :  { %2043 = shalt.err (!%p2040_p7)
}
  0x10   :  { %s2071_s28 = smov 256   ;;  %s2072_s29 = smov 16  }
  0x11   :  { %23 = dma.hbm_to_vmem [thread:$0]  %s3707_s0, 8192, %s18_s19, [#allocation3], %s2071_s28, %s2071_s28, %s2072_s29  }
  0x12   :  { %2066 = dma.done.wait [#allocation3], 8192  }
  0x13   :  { %2067 = vsyncadd [#allocation3], 4294959104  ;;  %vm3713_vm0 = vcmask 1044480   ;;  %v2123_v0 = vld [vmem:[%s3708_s1 + $0x30] sm:$0xff]  ;;  %v2128_v1 = vld [vmem:[%s3708_s1 + $0x38] sm:$0xff] }
  0x14   :  { %v1762_v2 = vld [vmem:[%s3708_s1 + $0x50] sm:$0x1f]  ;;  %v1763_v3 = vld [vmem:[%s3708_s1 + $0x58] sm:$0x1f]  ;;  %v1760_v4 = vld [vmem:[%s3708_s1 + $0x40] sm:$0xff] }
  0x15   :  { %v1761_v5 = vld [vmem:[%s3708_s1 + $0x48] sm:$0xff]  ;;  %v890_v6 = vsel %vm3713_vm0, %v1762_v2, -inf  ;;  %v899_v7 = vsel %vm3713_vm0, %v1763_v3, -inf  ;;  %v2147_v8 = vld [vmem:[%s3708_s1] sm:$0xff]  ;;  %v41_v13 = vld [vmem:[%s3708_s1 + $0x10] sm:$0xff] }
  0x16   :  { %v891_v9 = vmax.f32 %v2123_v0, %v890_v6  ;;  %v900_v10 = vmax.f32 %v2128_v1, %v899_v7  ;;  %v2154_v11 = vld [vmem:[%s3708_s1 + $0x8] sm:$0xff]  ;;  %v2159_v12 = vld [vmem:[%s3708_s1 + $0x20] sm:$0x1f]  ;;  %v42_v18 = vld [vmem:[%s3708_s1 + $0x18] sm:$0xff] }
  0x17   :  { %v2167_v14 = vld [vmem:[%s3708_s1 + $0x28] sm:$0x1f]  ;;  %v49_v15 = vsel %vm3713_vm0, %v2159_v12, -inf }
  0x18   :  { %v892_v16 = vmax.f32 %v891_v9, %v1760_v4  ;;  %v901_v17 = vmax.f32 %v900_v10, %v1761_v5  ;;  %v50_v19 = vmax.f32 %v2147_v8, %v49_v15  ;;  %v58_v20 = vsel %vm3713_vm0, %v2167_v14, -inf }
  0x19   :  { %v59_v21 = vmax.f32 %v2154_v11, %v58_v20 }
  0x1a   :  { %v893_v22 = vrot.slane %v892_v16, 4  ;;  %v902_v23 = vrot.slane %v901_v17, 4  ;;  %v51_v24 = vmax.f32 %v50_v19, %v41_v13 }
  0x1b   :  { %v60_v25 = vmax.f32 %v59_v21, %v42_v18 }
  0x1c   :  { %v894_v26 = vmax.f32 %v892_v16, %v893_v22  ;;  %v903_v27 = vmax.f32 %v901_v17, %v902_v23  ;;  %v52_v28 = vrot.slane %v51_v24, 4 }
  0x1d   :  { %v61_v29 = vrot.slane %v60_v25, 4 }
  0x1e   :  { %v895_v30 = vrot.slane %v894_v26, 2  ;;  %v904_v31 = vrot.slane %v903_v27, 2  ;;  %v53_v32 = vmax.f32 %v51_v24, %v52_v28 }
  0x1f   :  { %v62_v33 = vmax.f32 %v60_v25, %v61_v29 }
  0x20   :  { %v896_v34 = vmax.f32 %v894_v26, %v895_v30  ;;  %v905_v35 = vmax.f32 %v903_v27, %v904_v31  ;;  %v54_v36 = vrot.slane %v53_v32, 2 }
  0x21   :  { %v63_v37 = vrot.slane %v62_v33, 2 }
  0x22   :  { %v897_v38 = vrot.slane %v896_v34, 1  ;;  %v906_v39 = vrot.slane %v905_v35, 1  ;;  %v55_v40 = vmax.f32 %v53_v32, %v54_v36 }
  0x23   :  { %v64_v41 = vmax.f32 %v62_v33, %v63_v37 }
  0x24   :  { %v2178_v42 = vmax.f32 %v896_v34, %v897_v38  ;;  %v2180_v43 = vmax.f32 %v905_v35, %v906_v39  ;;  %v56_v44 = vrot.slane %v55_v40, 1 }
  0x25   :  { %v65_v45 = vrot.slane %v64_v41, 1 }
  0x26   :  { %v908_v46 = vsub.f32 %v2123_v0, %v2178_v42  ;;  %v909_v47 = vsub.f32 %v2128_v1, %v2180_v43  ;;  %v910_v48 = vsub.f32 %v1760_v4, %v2178_v42  ;;  %v911_v49 = vsub.f32 %v1761_v5, %v2180_v43 }
  0x27   :  { %v912_v50 = vsub.f32 %v1762_v2, %v2178_v42  ;;  %v913_v51 = vsub.f32 %v1763_v3, %v2180_v43  ;;  %v2190_v52 = vmax.f32 %v55_v40, %v56_v44  ;;  %v2192_v53 = vmax.f32 %v64_v41, %v65_v45 }
  0x28   :  { %v914_v54 = vmul.f32 1.442695, %v908_v46  ;;  %v916_v55 = vmul.f32 1.442695, %v909_v47  ;;  %v918_v56 = vmul.f32 1.442695, %v910_v48 }
  0x29   :  { %v920_v57 = vmul.f32 1.442695, %v911_v49  ;;  %v67_v58 = vsub.f32 %v2147_v8, %v2190_v52  ;;  %v922_v59 = vmul.f32 1.442695, %v912_v50  ;;  %v68_v60 = vsub.f32 %v2154_v11, %v2192_v53 }
  0x2a   :  { %1976 = vpow2.f32 %v914_v54  ;;  %v69_v61 = vsub.f32 %v41_v13, %v2190_v52  ;;  %v924_v62 = vmul.f32 1.442695, %v913_v51  ;;  %v70_v63 = vsub.f32 %v42_v18, %v2192_v53 }
  0x2b   :  { %1978 = vpow2.f32 %v916_v55  ;;  %v71_v2 = vsub.f32 %v2159_v12, %v2190_v52  ;;  %v73_v3 = vmul.f32 1.442695, %v67_v58  ;;  %v72_v4 = vsub.f32 %v2167_v14, %v2192_v53 }
  0x2c   :  { %1980 = vpow2.f32 %v918_v56  ;;  %v75_v5 = vmul.f32 1.442695, %v68_v60  ;;  %v77_v6 = vmul.f32 1.442695, %v69_v61  ;;  %v79_v7 = vmul.f32 1.442695, %v70_v63 }
  0x2d   :  { %1982 = vpow2.f32 %v920_v57  ;;  %v81_v9 = vmul.f32 1.442695, %v71_v2  ;;  %v83_v10 = vmul.f32 1.442695, %v72_v4  ;;  %v35_v2 = vlaneseq }
  0x2e   :  { %1984 = vpow2.f32 %v922_v59 }
  0x2f   :  { %1986 = vpow2.f32 %v924_v62 }
  0x30   :  { %1988 = vpow2.f32 %v73_v3  ;;  %v2073_v3 = vmov 1966171168  }
  0x31   :  { %1990 = vpow2.f32 %v75_v5  ;;  %v142_v4 = vunpack.c.l.s4 %v2073_v3 }
  0x32   :  { %1992 = vpow2.f32 %v77_v6 }
  0x33   :  { %1994 = vpow2.f32 %v79_v7 }
  0x34   :  { %v1977_v13 = vpop.eup %1976  ;;  %1996 = vpow2.f32 %v81_v9  ;;  %v2209_v9 = vshrl.u32 %v35_v2, 7 }
  0x35   :  { %v1979_v15 = vpop.eup %1978  ;;  %1998 = vpow2.f32 %v83_v10  ;;  %v143_v10 = vunpack.c.0.s8 %v142_v4 }
  0x36   :  { %v1981_v12 = vpop.eup %1980 }
  0x37   :  { %v1983_v16 = vpop.eup %1982  ;;  %v926_v17 = vadd.f32 %v1981_v12, %v1977_v13 }
  0x38   :  { %v1985_v18 = vpop.eup %1984  ;;  %v935_v14 = vadd.f32 %v1983_v16, %v1979_v15 }
  0x39   :  { %v1987_v19 = vpop.eup %1986  ;;  %v927_v20 = vsel %vm3713_vm0, %v1985_v18, 0.0  ;;  %v2220_v18 = vsub.s32 %v143_v10, %v2209_v9 }
  0x3a   :  { %v1989_v21 = vpop.eup %1988  ;;  %v928_v22 = vadd.f32 %v927_v20, %v926_v17  ;;  %v936_v23 = vsel %vm3713_vm0, %v1987_v19, 0.0 }
  0x3b   :  { %v1991_v24 = vpop.eup %1990  ;;  %v937_v25 = vadd.f32 %v936_v23, %v935_v14 }
  0x3c   :  { %v1993_v26 = vpop.eup %1992  ;;  %v929_v27 = vrot.slane %v928_v22, 4 }
  0x3d   :  { %v1995_v28 = vpop.eup %1994  ;;  %v938_v29 = vrot.slane %v937_v25, 4  ;;  %v85_v30 = vadd.f32 %v1993_v26, %v1989_v21 }
  0x3e   :  { %v1997_v31 = vpop.eup %1996  ;;  %v930_v32 = vadd.f32 %v929_v27, %v928_v22  ;;  %v94_v33 = vadd.f32 %v1995_v28, %v1991_v24  ;;  %v2237_v24 = vsub.s32 0, %v2209_v9 }
  0x3f   :  { %v1999_v34 = vpop.eup %1998  ;;  %v939_v35 = vadd.f32 %v938_v29, %v937_v25  ;;  %v86_v36 = vsel %vm3713_vm0, %v1997_v31, 0.0  ;;  %v2292_v31 = vsub.s32 1, %v2209_v9 }
  0x40   :  { %v931_v37 = vrot.slane %v930_v32, 2  ;;  %v87_v38 = vadd.f32 %v86_v36, %v85_v30  ;;  %v95_v39 = vsel %vm3713_vm0, %v1999_v34, 0.0  ;;  %v361_v36 = vld [vmem:[#allocation2 + $0x8] sm:$0xff] }
  0x41   :  { %v940_v40 = vrot.slane %v939_v35, 2  ;;  %v96_v41 = vadd.f32 %v95_v39, %v94_v33 }
  0x42   :  { %v932_v44 = vadd.f32 %v931_v37, %v930_v32  ;;  %v88_v45 = vrot.slane %v87_v38, 4  ;;  %v363_v37 = vld [vmem:[#allocation2 + $0x18] sm:$0xff] }
  0x43   :  { %v941_v46 = vadd.f32 %v940_v40, %v939_v35  ;;  %v97_v47 = vrot.slane %v96_v41, 4  ;;  %v360_v40 = vld [vmem:[#allocation2] sm:$0xff] }
  0x44   :  { %v933_v48 = vrot.slane %v932_v44, 1  ;;  %v89_v49 = vadd.f32 %v88_v45, %v87_v38  ;;  %v2074_v38 = vmov 0.0  }
  0x45   :  { %v942_v50 = vrot.slane %v941_v46, 1  ;;  %v98_v51 = vadd.f32 %v97_v47, %v96_v41 }
  0x46   :  { %v934_v54 = vadd.f32 %v933_v48, %v932_v44  ;;  %v90_v55 = vrot.slane %v89_v49, 2 }
  0x47   :  { %v943_v56 = vadd.f32 %v942_v50, %v941_v46  ;;  %v99_v57 = vrot.slane %v98_v51, 2 }
  0x48   :  { %2000 = vlog2.f32 %v934_v54  ;;  %v91_v58 = vadd.f32 %v90_v55, %v89_v49  ;;  %v362_v55 = vld [vmem:[#allocation2 + $0x10] sm:$0xff] }
  0x49   :  { %2002 = vlog2.f32 %v943_v56  ;;  %v100_v59 = vadd.f32 %v99_v57, %v98_v51 }
  0x4a   :  { %v92_v60 = vrot.slane %v91_v58, 1 }
  0x4b   :  { %v101_v61 = vrot.slane %v100_v59, 1 }
  0x4c   :  { %v93_v62 = vadd.f32 %v92_v60, %v91_v58 }
  0x4d   :  { %v102_v63 = vadd.f32 %v101_v61, %v100_v59 }
  0x4e   :  { %2004 = vlog2.f32 %v93_v62 }
  0x4f   :  { %2006 = vlog2.f32 %v102_v63 }
  0x52   :  { %v2001_v5 = vpop.eup %2000 }
  0x53   :  { %v2003_v6 = vpop.eup %2002  ;;  %v945_v7 = vmul.f32 0.6931472, %v2001_v5 }
  0x54   :  { %v947_v13 = vmul.f32 0.6931472, %v2003_v6 }
  0x55   :  { %v2212_v15 = vadd.f32 %v945_v7, %v2178_v42  ;;  %v2227_v42 = vld [vmem:[%s3709_s2 + $0x2] sm:$0x3]  ;;  %v365_v7 = vld [vmem:[#allocation2 + $0x28] sm:$0xff] }
  0x56   :  { %v2215_v12 = vadd.f32 %v947_v13, %v2180_v43  ;;  %vm3715_vm1 = vcmp.gt.s32.totalorder %v2227_v42, 0 }
  0x57   :  { %v976_v16 = vsub.f32 %v2212_v15, %v2123_v0 }
  0x58   :  { %v2005_v17 = vpop.eup %2004  ;;  %v977_v14 = vsub.f32 %v2215_v12, %v2128_v1 }
  0x59   :  { %v2007_v19 = vpop.eup %2006  ;;  %v104_v20 = vmul.f32 0.6931472, %v2005_v17 }
  0x5a   :  { %v980_v21 = vcombine.low %v976_v16, %v977_v14  ;;  %v106_v43 = vmul.f32 0.6931472, %v2007_v19 }
  0x5b   :  { %v2230_v22 = vadd.f32 %v104_v20, %v2190_v52 }
  0x5c   :  { %v987_v0 = vrot.slane %v980_v21, %v2220_v18  ;;  %v2234_v23 = vadd.f32 %v106_v43, %v2192_v53  ;;  %v2250_v53 = vld [vmem:[%s3709_s2] sm:$0x3]  ;;  %v367_v43 = vld [vmem:[#allocation2 + $0x38] sm:$0xff] }
  0x5d   :  { %v136_v1 = vsub.f32 %v2230_v22, %v2147_v8  ;;  %vm3714_vm2 = vcmp.gt.s32.totalorder %v2250_v53, 0 }
  0x5e   :  { %v994_v25 = vrot.slane %v987_v0, %v2220_v18  ;;  %v137_v26 = vsub.f32 %v2234_v23, %v2154_v11 }
  0x60   :  { %v996_v52 = vsel %vm3715_vm1, -1e+30, %v994_v25  ;;  %v140_v27 = vcombine.low %v136_v1, %v137_v26  ;;  %v364_v26 = vld [vmem:[#allocation2 + $0x20] sm:$0xff] }
  0x61   :  { %v2253_v28 = vrot.slane %v996_v52, %v2237_v24  ;;  %v2297_v32 = vrot.slane %v996_v52, %v2292_v31  ;;  %v366_v52 = vld [vmem:[#allocation2 + $0x30] sm:$0xff] }
  0x62   :  { %v147_v29 = vrot.slane %v140_v27, %v2220_v18 }
  0x63   :  { %1008 = vxpose.xlu1.b32.start [1/16] %v2253_v28, 128 }
  0x64   :  { %v154_v8 = vrot.slane %v147_v29, %v2220_v18 }
  0x66   :  { %v156_v11 = vsel %vm3714_vm2, -1e+30, %v154_v8 }
  0x67   :  { %v2262_v30 = vrot.slane %v156_v11, %v2237_v24  ;;  %1009 = vxpose.xlu1.b32.cont [2/16] %v2253_v28, 128  ;;  %v2303_v33 = vrot.slane %v156_v11, %v2292_v31 }
  0x69   :  { %168 = vxpose.xlu0.b32.start [1/16] %v2262_v30, 128 }
  0x6b   :  { %1010 = vxpose.xlu1.b32.cont [3/16] %v2253_v28, 128 }
  0x6d   :  { %169 = vxpose.xlu0.b32.cont [2/16] %v2262_v30, 128 }
  0x6f   :  { %1011 = vxpose.xlu1.b32.cont [4/16] %v2253_v28, 128 }
  0x71   :  { %170 = vxpose.xlu0.b32.cont [3/16] %v2262_v30, 128 }
  0x73   :  { %1012 = vxpose.xlu1.b32.cont [5/16] %v2253_v28, 128 }
  0x75   :  { %171 = vxpose.xlu0.b32.cont [4/16] %v2262_v30, 128 }
  0x77   :  { %1013 = vxpose.xlu1.b32.cont [6/16] %v2253_v28, 128 }
  0x79   :  { %172 = vxpose.xlu0.b32.cont [5/16] %v2262_v30, 128 }
  0x7b   :  { %1014 = vxpose.xlu1.b32.cont [7/16] %v2253_v28, 128 }
  0x7d   :  { %173 = vxpose.xlu0.b32.cont [6/16] %v2262_v30, 128 }
  0x7f   :  { %1015 = vxpose.xlu1.b32.cont [8/16] %v2253_v28, 128 }
  0x81   :  { %174 = vxpose.xlu0.b32.cont [7/16] %v2262_v30, 128 }
  0x83   :  { %1016 = vxpose.xlu1.b32.cont [9/16] %v2253_v28, 128 }
  0x85   :  { %175 = vxpose.xlu0.b32.cont [8/16] %v2262_v30, 128 }
  0x87   :  { %1017 = vxpose.xlu1.b32.cont [10/16] %v2253_v28, 128 }
  0x89   :  { %176 = vxpose.xlu0.b32.cont [9/16] %v2262_v30, 128 }
  0x8b   :  { %1018 = vxpose.xlu1.b32.cont [11/16] %v2253_v28, 128 }
  0x8d   :  { %177 = vxpose.xlu0.b32.cont [10/16] %v2262_v30, 128 }
  0x8f   :  { %1019 = vxpose.xlu1.b32.cont [12/16] %v2253_v28, 128 }
  0x91   :  { %178 = vxpose.xlu0.b32.cont [11/16] %v2262_v30, 128 }
  0x93   :  { %1020 = vxpose.xlu1.b32.cont [13/16] %v2253_v28, 128 }
  0x95   :  { %179 = vxpose.xlu0.b32.cont [12/16] %v2262_v30, 128 }
  0x97   :  { %1021 = vxpose.xlu1.b32.cont [14/16] %v2253_v28, 128 }
  0x99   :  { %180 = vxpose.xlu0.b32.cont [13/16] %v2262_v30, 128 }
  0x9b   :  { %1022 = vxpose.xlu1.b32.cont [15/16] %v2253_v28, 128 }
  0x9d   :  { %181 = vxpose.xlu0.b32.cont [14/16] %v2262_v30, 128 }
  0x9f   :  { %1023 = vxpose.xlu1.b32.end [16/16] %v2253_v28, 128 }
  0xa1   :  { %182 = vxpose.xlu0.b32.cont [15/16] %v2262_v30, 128 }
  0xa3   :  { %1040 = vxpose.xlu1.b32.start [1/16] %v2297_v32, 128 }
  0xa5   :  { %183 = vxpose.xlu0.b32.end [16/16] %v2262_v30, 128 }
  0xa7   :  { %1041 = vxpose.xlu1.b32.cont [2/16] %v2297_v32, 128 }
  0xa9   :  { %200 = vxpose.xlu0.b32.start [1/16] %v2303_v33, 128 }
  0xab   :  { %1042 = vxpose.xlu1.b32.cont [3/16] %v2297_v32, 128 }
  0xad   :  { %201 = vxpose.xlu0.b32.cont [2/16] %v2303_v33, 128 }
  0xaf   :  { %1043 = vxpose.xlu1.b32.cont [4/16] %v2297_v32, 128 }
  0xb1   :  { %202 = vxpose.xlu0.b32.cont [3/16] %v2303_v33, 128 }
  0xb3   :  { %1044 = vxpose.xlu1.b32.cont [5/16] %v2297_v32, 128 }
  0xb5   :  { %203 = vxpose.xlu0.b32.cont [4/16] %v2303_v33, 128 }
  0xb7   :  { %1045 = vxpose.xlu1.b32.cont [6/16] %v2297_v32, 128 }
  0xb9   :  { %204 = vxpose.xlu0.b32.cont [5/16] %v2303_v33, 128 }
  0xbb   :  { %1046 = vxpose.xlu1.b32.cont [7/16] %v2297_v32, 128 }
  0xbd   :  { %205 = vxpose.xlu0.b32.cont [6/16] %v2303_v33, 128 }
  0xbf   :  { %1047 = vxpose.xlu1.b32.cont [8/16] %v2297_v32, 128 }
  0xc1   :  { %206 = vxpose.xlu0.b32.cont [7/16] %v2303_v33, 128 }
  0xc3   :  { %1048 = vxpose.xlu1.b32.cont [9/16] %v2297_v32, 128 }
  0xc5   :  { %207 = vxpose.xlu0.b32.cont [8/16] %v2303_v33, 128 }
  0xc7   :  { %1049 = vxpose.xlu1.b32.cont [10/16] %v2297_v32, 128 }
  0xc9   :  { %208 = vxpose.xlu0.b32.cont [9/16] %v2303_v33, 128 }
  0xcb   :  { %1050 = vxpose.xlu1.b32.cont [11/16] %v2297_v32, 128 }
  0xcd   :  { %209 = vxpose.xlu0.b32.cont [10/16] %v2303_v33, 128 }
  0xcf   :  { %1051 = vxpose.xlu1.b32.cont [12/16] %v2297_v32, 128 }
  0xd1   :  { %210 = vxpose.xlu0.b32.cont [11/16] %v2303_v33, 128 }
  0xd3   :  { %1052 = vxpose.xlu1.b32.cont [13/16] %v2297_v32, 128 }
  0xd5   :  { %211 = vxpose.xlu0.b32.cont [12/16] %v2303_v33, 128 }
  0xd7   :  { %1053 = vxpose.xlu1.b32.cont [14/16] %v2297_v32, 128 }
  0xd9   :  { %212 = vxpose.xlu0.b32.cont [13/16] %v2303_v33, 128 }
  0xdb   :  { %1054 = vxpose.xlu1.b32.cont [15/16] %v2297_v32, 128 }
  0xdd   :  { %213 = vxpose.xlu0.b32.cont [14/16] %v2303_v33, 128 }
  0xdf   :  { %1055 = vxpose.xlu1.b32.end [16/16] %v2297_v32, 128 }
  0xe1   :  { %214 = vxpose.xlu0.b32.cont [15/16] %v2303_v33, 128 }
  0xe3   :  { %v1024_v34 = vpop.trf.xlu1 }
  0xe4   :  { %vm1073_vm3 = vcmp.gt.f32.partialorder %v1024_v34, %v2297_v32  ;;  %vm1072_vm4 = vcmp.gt.f32.partialorder %v1024_v34, %v2253_v28  ;;  %vm1137_vm5 = vcmp.eq.f32.partialorder %v1024_v34, %v2297_v32  ;;  %vm1136_vm6 = vcmp.eq.f32.partialorder %v1024_v34, %v2253_v28 }
  0xe5   :  { %215 = vxpose.xlu0.b32.end [16/16] %v2303_v33, 128  ;;  %v1769_v39 = vsel %vm1073_vm3, 1.0, %v2074_v38  ;;  %v1768_v41 = vsel %vm1072_vm4, 1.0, %v2074_v38 }
  0xe6   :  { %v1329_v46 = vsel %vm1137_vm5, %v361_v36, %v1769_v39  ;;  %v1328_v51 = vsel %vm1136_vm6, %v360_v40, %v1768_v41 }
  0xe7   :  { %v1025_v35 = vpop.trf.xlu1 }
  0xe8   :  { %vm1075_vm7 = vcmp.gt.f32.partialorder %v1025_v35, %v2297_v32  ;;  %vm1139_vm8 = vcmp.eq.f32.partialorder %v1025_v35, %v2297_v32  ;;  %vm1074_vm9 = vcmp.gt.f32.partialorder %v1025_v35, %v2253_v28  ;;  %vm1138_vm12 = vcmp.eq.f32.partialorder %v1025_v35, %v2253_v28 }
  0xe9   :  { %v184_v44 = vpop.trf.xlu0  ;;  %v1771_v45 = vsel %vm1075_vm7, 1.0, %v2074_v38  ;;  %v1770_v50 = vsel %vm1074_vm9, 1.0, %v2074_v38 }
  0xea   :  { %vm233_vm10 = vcmp.gt.f32.partialorder %v184_v44, %v2303_v33  ;;  %v1331_v47 = vsel %vm1139_vm8, %v363_v37, %v1771_v45  ;;  %vm232_vm11 = vcmp.gt.f32.partialorder %v184_v44, %v2262_v30  ;;  %vm297_vm14 = vcmp.eq.f32.partialorder %v184_v44, %v2303_v33 }
  0xeb   :  { %v2348_v48 = vpop.trf.xlu1  ;;  %v1904_v49 = vpack.c.bf16 %v1331_v47, %v1329_v46  ;;  %v1687_v54 = vsel %vm233_vm10, 1.0, %v2074_v38  ;;  %vm296_vm15 = vcmp.eq.f32.partialorder %v184_v44, %v2262_v30  ;;  %v1686_v58 = vsel %vm232_vm11, 1.0, %v2074_v38 }
  0xec   :  { %vm1077_vm13 = vcmp.gt.f32.partialorder %v2348_v48, %v2297_v32  ;;  %vm1076_vm3 = vcmp.gt.f32.partialorder %v2348_v48, %v2253_v28  ;;  %vm1141_vm4 = vcmp.eq.f32.partialorder %v2348_v48, %v2297_v32  ;;  %v553_v60 = vsel %vm297_vm14, %v361_v36, %v1687_v54 }
  0xed   :  { %v185_v56 = vpop.trf.xlu0  ;;  %v1773_v57 = vsel %vm1077_vm13, 1.0, %v2074_v38  ;;  %1905 = vmatprep.subr.bf16.mxu1 %v1904_v49  ;;  %v1330_v62 = vsel %vm1138_vm12, %v362_v55, %v1770_v50  ;;  %v552_v4 = vsel %vm296_vm15, %v360_v40, %v1686_v58  ;;  %vm1140_vm13 = vcmp.eq.f32.partialorder %v2348_v48, %v2253_v28  ;;  %v371_v58 = vld [vmem:[#allocation2 + $0x58] sm:$0xff] }
  0xee   :  { %vm235_vm5 = vcmp.gt.f32.partialorder %v185_v56, %v2303_v33  ;;  %vm299_vm6 = vcmp.eq.f32.partialorder %v185_v56, %v2303_v33  ;;  %vm234_vm7 = vcmp.gt.f32.partialorder %v185_v56, %v2262_v30  ;;  %vm298_vm8 = vcmp.eq.f32.partialorder %v185_v56, %v2262_v30 }
  0xef   :  { %v1689_v59 = vsel %vm235_vm5, 1.0, %v2074_v38  ;;  %v1688_v61 = vsel %vm234_vm7, 1.0, %v2074_v38  ;;  %v1027_v63 = vpop.trf.xlu1  ;;  %v1906_v6 = vpack.c.bf16 %v1330_v62, %v1328_v51  ;;  %v1772_v17 = vsel %vm1076_vm3, 1.0, %v2074_v38  ;;  %v368_v62 = vld [vmem:[#allocation2 + $0x40] sm:$0xff] }
  0xf0   :  { %v555_v3 = vsel %vm299_vm6, %v363_v37, %v1689_v59  ;;  %v554_v5 = vsel %vm298_vm8, %v362_v55, %v1688_v61  ;;  %vm1079_vm9 = vcmp.gt.f32.partialorder %v1027_v63, %v2297_v32  ;;  %vm1078_vm12 = vcmp.gt.f32.partialorder %v1027_v63, %v2253_v28  ;;  %v370_v59 = vld [vmem:[#allocation2 + $0x50] sm:$0xff] }
  0xf1   :  { %v186_v10 = vpop.trf.xlu0  ;;  %v1840_v13 = vpack.c.bf16 %v555_v3, %v553_v60  ;;  %v1842_v16 = vpack.c.bf16 %v554_v5, %v552_v4  ;;  %1907 = vmatpush1.bf16.msra.mxu1 %v1906_v6  ;;  %vm1142_vm14 = vcmp.eq.f32.partialorder %v1027_v63, %v2253_v28  ;;  %v1333_v19 = vsel %vm1141_vm4, %v365_v7, %v1773_v57  ;;  %v369_v57 = vld [vmem:[#allocation2 + $0x48] sm:$0xff] }
  0xf2   :  { %vm236_vm10 = vcmp.gt.f32.partialorder %v186_v10, %v2262_v30  ;;  %vm237_vm11 = vcmp.gt.f32.partialorder %v186_v10, %v2303_v33  ;;  %vm301_vm15 = vcmp.eq.f32.partialorder %v186_v10, %v2303_v33  ;;  %vm1143_vm5 = vcmp.eq.f32.partialorder %v1027_v63, %v2297_v32 }
  0xf3   :  { %1841 = vmatprep.subr.bf16.mxu0 %v1840_v13  ;;  %v2388_v14 = vpop.trf.xlu1  ;;  %v1691_v20 = vsel %vm237_vm11, 1.0, %v2074_v38  ;;  %v1775_v21 = vsel %vm1079_vm9, 1.0, %v2074_v38  ;;  %vm300_vm3 = vcmp.eq.f32.partialorder %v186_v10, %v2262_v30  ;;  %v1690_v0 = vsel %vm236_vm10, 1.0, %v2074_v38 }
  0xf4   :  { %1843 = vmatpush1.bf16.msra.mxu0 %v1842_v16  ;;  %v1774_v1 = vsel %vm1078_vm12, 1.0, %v2074_v38  ;;  %vm1080_vm4 = vcmp.gt.f32.partialorder %v2388_v14, %v2253_v28  ;;  %v557_v8 = vsel %vm301_vm15, %v365_v7, %v1691_v20  ;;  %v1335_v11 = vsel %vm1143_vm5, %v367_v43, %v1775_v21 }
  0xf5   :  { %v187_v25 = vpop.trf.xlu0  ;;  %v1908_v36 = vpack.c.bf16 %v1335_v11, %v1333_v19  ;;  %v556_v37 = vsel %vm300_vm3, %v364_v26, %v1690_v0  ;;  %vm1081_vm10 = vcmp.gt.f32.partialorder %v2388_v14, %v2297_v32  ;;  %v1334_v45 = vsel %vm1142_vm14, %v366_v52, %v1774_v1  ;;  %v373_v11 = vld [vmem:[#allocation2 + $0x68] sm:$0xff] }
  0xf6   :  { %vm238_vm6 = vcmp.gt.f32.partialorder %v187_v25, %v2262_v30  ;;  %vm239_vm7 = vcmp.gt.f32.partialorder %v187_v25, %v2303_v33  ;;  %vm302_vm8 = vcmp.eq.f32.partialorder %v187_v25, %v2262_v30  ;;  %vm303_vm9 = vcmp.eq.f32.partialorder %v187_v25, %v2303_v33 }
  0xf7   :  { %v1692_v27 = vsel %vm238_vm6, 1.0, %v2074_v38  ;;  %v1693_v29 = vsel %vm239_vm7, 1.0, %v2074_v38  ;;  %v2414_v34 = vpop.trf.xlu1  ;;  %vm1144_vm11 = vcmp.eq.f32.partialorder %v2388_v14, %v2253_v28  ;;  %1909 = vmatprep.subr.bf16.mxu1 %v1908_v36  ;;  %v1332_v46 = vsel %vm1140_vm13, %v364_v26, %v1772_v17 }
  0xf8   :  { %v559_v35 = vsel %vm303_vm9, %v367_v43, %v1693_v29  ;;  %v558_v39 = vsel %vm302_vm8, %v366_v52, %v1692_v27  ;;  %vm1145_vm5 = vcmp.eq.f32.partialorder %v2388_v14, %v2297_v32  ;;  %v1776_v47 = vsel %vm1080_vm4, 1.0, %v2074_v38  ;;  %v375_v52 = vld [vmem:[#allocation2 + $0x78] sm:$0xff] }
  0xf9   :  { %v188_v40 = vpop.trf.xlu0  ;;  %v1844_v41 = vpack.c.bf16 %v559_v35, %v557_v8  ;;  %v1846_v44 = vpack.c.bf16 %v558_v39, %v556_v37  ;;  %v1910_v49 = vpack.c.bf16 %v1334_v45, %v1332_v46  ;;  %vm1083_vm14 = vcmp.gt.f32.partialorder %v2414_v34, %v2297_v32  ;;  %v374_v45 = vld [vmem:[#allocation2 + $0x70] sm:$0xff] }
  0xfa   :  { %vm240_vm12 = vcmp.gt.f32.partialorder %v188_v40, %v2262_v30  ;;  %vm241_vm15 = vcmp.gt.f32.partialorder %v188_v40, %v2303_v33  ;;  %v1777_v48 = vsel %vm1081_vm10, 1.0, %v2074_v38  ;;  %vm304_vm13 = vcmp.eq.f32.partialorder %v188_v40, %v2262_v30 }
  0xfb   :  { %1845 = vmatprep.subr.bf16.mxu0 %v1844_v41  ;;  %v2437_v50 = vpop.trf.xlu1  ;;  %vm305_vm3 = vcmp.eq.f32.partialorder %v188_v40, %v2303_v33  ;;  %vm1082_vm4 = vcmp.gt.f32.partialorder %v2414_v34, %v2253_v28  ;;  %v1694_v51 = vsel %vm240_vm12, 1.0, %v2074_v38  ;;  %v1695_v54 = vsel %vm241_vm15, 1.0, %v2074_v38  ;;  %1911 = vmatpush1.bf16.msra.mxu1 %v1910_v49 }
  0xfc   :  { %1847 = vmatpush1.bf16.msra.mxu0 %v1846_v44  ;;  %vm1147_vm6 = vcmp.eq.f32.partialorder %v2414_v34, %v2297_v32  ;;  %v1779_v55 = vsel %vm1083_vm14, 1.0, %v2074_v38  ;;  %vm1146_vm12 = vcmp.eq.f32.partialorder %v2414_v34, %v2253_v28  ;;  %vm1084_vm15 = vcmp.gt.f32.partialorder %v2437_v50, %v2253_v28  ;;  %v372_v44 = vld [vmem:[#allocation2 + $0x60] sm:$0xff] }
  0xfd   :  { %v189_v56 = vpop.trf.xlu0  ;;  %v561_v3 = vsel %vm305_vm3, %v369_v57, %v1695_v54  ;;  %v1337_v5 = vsel %vm1145_vm5, %v369_v57, %v1777_v48  ;;  %v1339_v6 = vsel %vm1147_vm6, %v371_v58, %v1779_v55  ;;  %v1778_v7 = vsel %vm1082_vm4, 1.0, %v2074_v38 }
  0xfe   :  { %vm242_vm7 = vcmp.gt.f32.partialorder %v189_v56, %v2262_v30  ;;  %vm243_vm8 = vcmp.gt.f32.partialorder %v189_v56, %v2303_v33  ;;  %vm306_vm9 = vcmp.eq.f32.partialorder %v189_v56, %v2262_v30  ;;  %vm307_vm10 = vcmp.eq.f32.partialorder %v189_v56, %v2303_v33 }
  0xff   :  { %v1696_v60 = vsel %vm242_vm7, 1.0, %v2074_v38  ;;  %v1697_v61 = vsel %vm243_vm8, 1.0, %v2074_v38  ;;  %v2462_v63 = vpop.trf.xlu1  ;;  %v1912_v16 = vpack.c.bf16 %v1339_v6, %v1337_v5  ;;  %vm1085_vm14 = vcmp.gt.f32.partialorder %v2437_v50, %v2297_v32 }
 0x100   :  { %v563_v4 = vsel %vm307_vm10, %v371_v58, %v1697_v61  ;;  %v562_v17 = vsel %vm306_vm9, %v370_v59, %v1696_v60  ;;  %v560_v19 = vsel %vm304_vm13, %v368_v62, %v1694_v51  ;;  %vm1148_vm5 = vcmp.eq.f32.partialorder %v2437_v50, %v2253_v28 }
 0x101   :  { %v190_v10 = vpop.trf.xlu0  ;;  %v1848_v13 = vpack.c.bf16 %v563_v4, %v561_v3  ;;  %vm1149_vm3 = vcmp.eq.f32.partialorder %v2437_v50, %v2297_v32  ;;  %v1780_v20 = vsel %vm1084_vm15, 1.0, %v2074_v38  ;;  %1913 = vmatprep.subr.bf16.mxu1 %v1912_v16  ;;  %v1850_v21 = vpack.c.bf16 %v562_v17, %v560_v19  ;;  %v376_v17 = vld [vmem:[#allocation2 + $0x80] sm:$0xff]  ;;  %v378_v19 = vld [vmem:[#allocation2 + $0x90] sm:$0xff] }
 0x102   :  { %vm245_vm4 = vcmp.gt.f32.partialorder %v190_v10, %v2303_v33  ;;  %v1336_v0 = vsel %vm1144_vm11, %v368_v62, %v1776_v47  ;;  %v1338_v1 = vsel %vm1146_vm12, %v370_v59, %v1778_v7  ;;  %vm1087_vm13 = vcmp.gt.f32.partialorder %v2462_v63, %v2297_v32  ;;  %v377_v7 = vld [vmem:[#allocation2 + $0x88] sm:$0xff] }
 0x103   :  { %1849 = vmatprep.subr.bf16.mxu0 %v1848_v13  ;;  %v2490_v43 = vpop.trf.xlu1  ;;  %vm244_vm6 = vcmp.gt.f32.partialorder %v190_v10, %v2262_v30  ;;  %v1914_v25 = vpack.c.bf16 %v1338_v1, %v1336_v0  ;;  %vm1086_vm7 = vcmp.gt.f32.partialorder %v2462_v63, %v2253_v28  ;;  %vm1151_vm8 = vcmp.eq.f32.partialorder %v2462_v63, %v2297_v32 }
 0x104   :  { %1851 = vmatpush1.bf16.msra.mxu0 %v1850_v21  ;;  %v1783_v14 = vsel %vm1087_vm13, 1.0, %v2074_v38  ;;  %v1781_v27 = vsel %vm1085_vm14, 1.0, %v2074_v38  ;;  %vm309_vm12 = vcmp.eq.f32.partialorder %v190_v10, %v2303_v33  ;;  %v1699_v29 = vsel %vm245_vm4, 1.0, %v2074_v38 }
 0x105   :  { %v191_v26 = vpop.trf.xlu0  ;;  %1915 = vmatpush1.bf16.msra.mxu1 %v1914_v25  ;;  %vm308_vm15 = vcmp.eq.f32.partialorder %v190_v10, %v2262_v30  ;;  %v1698_v35 = vsel %vm244_vm6, 1.0, %v2074_v38  ;;  %vm1150_vm14 = vcmp.eq.f32.partialorder %v2462_v63, %v2253_v28  ;;  %v1782_v36 = vsel %vm1086_vm7, 1.0, %v2074_v38  ;;  %v379_v10 = vld [vmem:[#allocation2 + $0x98] sm:$0xff] }
 0x106   :  { %vm246_vm11 = vcmp.gt.f32.partialorder %v191_v26, %v2262_v30  ;;  %vm247_vm9 = vcmp.gt.f32.partialorder %v191_v26, %v2303_v33  ;;  %vm311_vm10 = vcmp.eq.f32.partialorder %v191_v26, %v2303_v33  ;;  %vm310_vm4 = vcmp.eq.f32.partialorder %v191_v26, %v2262_v30 }
 0x107   :  { %v1701_v8 = vsel %vm247_vm9, 1.0, %v2074_v38  ;;  %v2519_v34 = vpop.trf.xlu1  ;;  %v1700_v37 = vsel %vm246_vm11, 1.0, %v2074_v38  ;;  %v1343_v41 = vsel %vm1151_vm8, %v375_v52, %v1783_v14  ;;  %v565_v46 = vsel %vm309_vm12, %v373_v11, %v1699_v29 }
 0x108   :  { %v567_v40 = vsel %vm311_vm10, %v375_v52, %v1701_v8  ;;  %v1341_v47 = vsel %vm1149_vm3, %v373_v11, %v1781_v27  ;;  %vm1088_vm13 = vcmp.gt.f32.partialorder %v2490_v43, %v2253_v28  ;;  %vm1089_vm6 = vcmp.gt.f32.partialorder %v2490_v43, %v2297_v32 }
 0x109   :  { %v2535_v39 = vpop.trf.xlu0  ;;  %v1852_v49 = vpack.c.bf16 %v567_v40, %v565_v46  ;;  %v1916_v48 = vpack.c.bf16 %v1343_v41, %v1341_v47  ;;  %v564_v54 = vsel %vm308_vm15, %v372_v44, %v1698_v35  ;;  %v566_v55 = vsel %vm310_vm4, %v374_v45, %v1700_v37  ;;  %v381_v46 = vld [vmem:[#allocation2 + $0xa8] sm:$0xff]  ;;  %v383_v47 = vld [vmem:[#allocation2 + $0xb8] sm:$0xff] }
 0x10a   :  { %v1340_v56 = vsel %vm1148_vm5, %v372_v44, %v1780_v20  ;;  %v1342_v57 = vsel %vm1150_vm14, %v374_v45, %v1782_v36  ;;  %vm249_vm3 = vcmp.gt.f32.partialorder %v2535_v39, %v2303_v33  ;;  %v1854_v58 = vpack.c.bf16 %v566_v55, %v564_v54  ;;  %v380_v54 = vld [vmem:[#allocation2 + $0xa0] sm:$0xff]  ;;  %v382_v55 = vld [vmem:[#allocation2 + $0xb0] sm:$0xff] }
 0x10b   :  { %v2551_v51 = vpop.trf.xlu1  ;;  %1853 = vmatprep.subr.bf16.mxu0 %v1852_v49  ;;  %1917 = vmatprep.subr.bf16.mxu1 %v1916_v48  ;;  %v1918_v59 = vpack.c.bf16 %v1342_v57, %v1340_v56  ;;  %vm1152_vm7 = vcmp.eq.f32.partialorder %v2490_v43, %v2253_v28  ;;  %vm1153_vm8 = vcmp.eq.f32.partialorder %v2490_v43, %v2297_v32  ;;  %v2075_v50 = vmov 1.0  }
 0x10c   :  { %vm1091_vm5 = vcmp.gt.f32.partialorder %v2519_v34, %v2297_v32  ;;  %680 = vmatprep.mubr.f32.mxu0 %v2075_v50  ;;  %1456 = vmatprep.mubr.f32.mxu1 %v2075_v50  ;;  %v1784_v61 = vsel %vm1088_vm13, 1.0, %v2074_v38  ;;  %vm248_vm11 = vcmp.gt.f32.partialorder %v2535_v39, %v2262_v30  ;;  %v1785_v63 = vsel %vm1089_vm6, 1.0, %v2074_v38 }
 0x10d   :  { %v193_v60 = vpop.trf.xlu0  ;;  %1855 = vmatpush1.bf16.msra.mxu0 %v1854_v58  ;;  %1919 = vmatpush1.bf16.msra.mxu1 %v1918_v59  ;;  %vm313_vm12 = vcmp.eq.f32.partialorder %v2535_v39, %v2303_v33  ;;  %v1703_v3 = vsel %vm249_vm3, 1.0, %v2074_v38  ;;  %vm1090_vm15 = vcmp.gt.f32.partialorder %v2519_v34, %v2253_v28  ;;  %vm1155_vm14 = vcmp.eq.f32.partialorder %v2519_v34, %v2297_v32 }
 0x10e   :  { %vm250_vm9 = vcmp.gt.f32.partialorder %v193_v60, %v2262_v30  ;;  %vm251_vm10 = vcmp.gt.f32.partialorder %v193_v60, %v2303_v33  ;;  %v1787_v4 = vsel %vm1091_vm5, 1.0, %v2074_v38  ;;  %vm315_vm4 = vcmp.eq.f32.partialorder %v193_v60, %v2303_v33 }
 0x10f   :  { %v2579_v62 = vpop.trf.xlu1  ;;  %v1705_v5 = vsel %vm251_vm10, 1.0, %v2074_v38  ;;  %vm312_vm13 = vcmp.eq.f32.partialorder %v2535_v39, %v2262_v30  ;;  %v1702_v13 = vsel %vm248_vm11, 1.0, %v2074_v38  ;;  %vm314_vm6 = vcmp.eq.f32.partialorder %v193_v60, %v2262_v30 }
 0x110   :  { %v1704_v16 = vsel %vm250_vm9, 1.0, %v2074_v38  ;;  %vm1154_vm3 = vcmp.eq.f32.partialorder %v2519_v34, %v2253_v28  ;;  %v1786_v20 = vsel %vm1090_vm15, 1.0, %v2074_v38  ;;  %vm1092_vm5 = vcmp.gt.f32.partialorder %v2551_v51, %v2253_v28 }
 0x111   :  { %v2601_v6 = vpop.trf.xlu0  ;;  %vm1093_vm10 = vcmp.gt.f32.partialorder %v2551_v51, %v2297_v32  ;;  %vm1156_vm11 = vcmp.eq.f32.partialorder %v2551_v51, %v2253_v28  ;;  %v569_v0 = vsel %vm313_vm12, %v377_v7, %v1703_v3  ;;  %v571_v1 = vsel %vm315_vm4, %v379_v10, %v1705_v5 }
 0x112   :  { %v1345_v25 = vsel %vm1153_vm8, %v377_v7, %v1785_v63  ;;  %v1347_v26 = vsel %vm1155_vm14, %v379_v10, %v1787_v4  ;;  %v1856_v14 = vpack.c.bf16 %v571_v1, %v569_v0  ;;  %v568_v27 = vsel %vm312_vm13, %v376_v17, %v1702_v13 }
 0x113   :  { %v2620_v21 = vpop.trf.xlu1  ;;  %v1920_v52 = vpack.c.bf16 %v1347_v26, %v1345_v25  ;;  %v570_v29 = vsel %vm314_vm6, %v378_v19, %v1704_v16  ;;  %vm253_vm9 = vcmp.gt.f32.partialorder %v2601_v6, %v2303_v33  ;;  %v1344_v35 = vsel %vm1152_vm7, %v376_v17, %v1784_v61  ;;  %v385_v26 = vld [vmem:[#allocation2 + $0xc8] sm:$0xff] }
 0x114   :  { %v1858_v11 = vpack.c.bf16 %v570_v29, %v568_v27  ;;  %v1346_v36 = vsel %vm1154_vm3, %v378_v19, %v1786_v20  ;;  %vm1157_vm8 = vcmp.eq.f32.partialorder %v2551_v51, %v2297_v32  ;;  %v1788_v37 = vsel %vm1092_vm5, 1.0, %v2074_v38  ;;  %1857 = vmatprep.subr.bf16.mxu0 %v1856_v14  ;;  %v387_v14 = vld [vmem:[#allocation2 + $0xd8] sm:$0xff] }
 0x115   :  { %v195_v8 = vpop.trf.xlu0  ;;  %1921 = vmatprep.subr.bf16.mxu1 %v1920_v52  ;;  %v1922_v39 = vpack.c.bf16 %v1346_v36, %v1344_v35  ;;  %vm1095_vm12 = vcmp.gt.f32.partialorder %v2579_v62, %v2297_v32  ;;  %v1789_v34 = vsel %vm1093_vm10, 1.0, %v2074_v38  ;;  %vm252_vm7 = vcmp.gt.f32.partialorder %v2601_v6, %v2262_v30 }
 0x116   :  { %1859 = vmatpush1.bf16.msra.mxu0 %v1858_v11  ;;  %vm254_vm15 = vcmp.gt.f32.partialorder %v195_v8, %v2262_v30  ;;  %vm255_vm14 = vcmp.gt.f32.partialorder %v195_v8, %v2303_v33  ;;  %vm316_vm4 = vcmp.eq.f32.partialorder %v2601_v6, %v2262_v30  ;;  %vm317_vm13 = vcmp.eq.f32.partialorder %v2601_v6, %v2303_v33  ;;  %v386_v11 = vld [vmem:[#allocation2 + $0xd0] sm:$0xff] }
 0x117   :  { %v2656_v43 = vpop.trf.xlu1  ;;  %v1707_v40 = vsel %vm253_vm9, 1.0, %v2074_v38  ;;  %1923 = vmatpush1.bf16.msra.mxu1 %v1922_v39  ;;  %vm1094_vm6 = vcmp.gt.f32.partialorder %v2579_v62, %v2253_v28  ;;  %vm1159_vm3 = vcmp.eq.f32.partialorder %v2579_v62, %v2297_v32  ;;  %v1791_v44 = vsel %vm1095_vm12, 1.0, %v2074_v38 }
 0x118   :  { %vm319_vm5 = vcmp.eq.f32.partialorder %v195_v8, %v2303_v33  ;;  %v1709_v45 = vsel %vm255_vm14, 1.0, %v2074_v38  ;;  %v1706_v49 = vsel %vm252_vm7, 1.0, %v2074_v38  ;;  %vm1158_vm10 = vcmp.eq.f32.partialorder %v2579_v62, %v2253_v28 }
 0x119   :  { %v2676_v41 = vpop.trf.xlu0  ;;  %vm318_vm9 = vcmp.eq.f32.partialorder %v195_v8, %v2262_v30  ;;  %v1708_v48 = vsel %vm254_vm15, 1.0, %v2074_v38  ;;  %v1790_v57 = vsel %vm1094_vm6, 1.0, %v2074_v38  ;;  %vm1096_vm12 = vcmp.gt.f32.partialorder %v2620_v21, %v2253_v28  ;;  %v384_v8 = vld [vmem:[#allocation2 + $0xc0] sm:$0xff] }
 0x11a   :  { %vm1097_vm7 = vcmp.gt.f32.partialorder %v2620_v21, %v2297_v32  ;;  %vm256_vm14 = vcmp.gt.f32.partialorder %v2676_v41, %v2262_v30  ;;  %vm1160_vm0 = vcmp.eq.f32.partialorder %v2620_v21, %v2253_v28  ;;  %v573_v58 = vsel %vm317_vm13, %v381_v46, %v1707_v40 }
 0x11b   :  { %v2693_v56 = vpop.trf.xlu1  ;;  %v575_v59 = vsel %vm319_vm5, %v383_v47, %v1709_v45  ;;  %v1349_v60 = vsel %vm1157_vm8, %v381_v46, %v1789_v34  ;;  %v1351_v61 = vsel %vm1159_vm3, %v383_v47, %v1791_v44  ;;  %v572_v5 = vsel %vm316_vm4, %v380_v54, %v1706_v49 }
 0x11c   :  { %v1860_v3 = vpack.c.bf16 %v575_v59, %v573_v58  ;;  %v1924_v4 = vpack.c.bf16 %v1351_v61, %v1349_v60  ;;  %v574_v7 = vsel %vm318_vm9, %v382_v55, %v1708_v48  ;;  %vm257_vm15 = vcmp.gt.f32.partialorder %v2676_v41, %v2303_v33 }
 0x11d   :  { %v197_v63 = vpop.trf.xlu0  ;;  %v1862_v10 = vpack.c.bf16 %v574_v7, %v572_v5  ;;  %v1348_v13 = vsel %vm1156_vm11, %v380_v54, %v1788_v37  ;;  %v1350_v16 = vsel %vm1158_vm10, %v382_v55, %v1790_v57  ;;  %vm1161_vm8 = vcmp.eq.f32.partialorder %v2620_v21, %v2297_v32  ;;  %v388_v7 = vld [vmem:[#allocation2 + $0xe0] sm:$0xff] }
 0x11e   :  { %v1792_v6 = vsel %vm1096_vm12, 1.0, %v2074_v38  ;;  %1861 = vmatprep.subr.bf16.mxu0 %v1860_v3  ;;  %1925 = vmatprep.subr.bf16.mxu1 %v1924_v4  ;;  %v1926_v19 = vpack.c.bf16 %v1350_v16, %v1348_v13  ;;  %vm1099_vm11 = vcmp.gt.f32.partialorder %v2656_v43, %v2297_v32  ;;  %v1793_v51 = vsel %vm1097_vm7, 1.0, %v2074_v38  ;;  %v391_v3 = vld [vmem:[#allocation2 + $0xf8] sm:$0xff] }
 0x11f   :  { %v2728_v17 = vpop.trf.xlu1  ;;  %1863 = vmatpush1.bf16.msra.mxu0 %v1862_v10  ;;  %vm1098_vm4 = vcmp.gt.f32.partialorder %v2656_v43, %v2253_v28  ;;  %vm258_vm13 = vcmp.gt.f32.partialorder %v197_v63, %v2262_v30  ;;  %vm259_vm6 = vcmp.gt.f32.partialorder %v197_v63, %v2303_v33  ;;  %vm320_vm3 = vcmp.eq.f32.partialorder %v2676_v41, %v2262_v30  ;;  %v390_v10 = vld [vmem:[#allocation2 + $0xf0] sm:$0xff] }
 0x120   :  { %vm321_vm5 = vcmp.eq.f32.partialorder %v2676_v41, %v2303_v33  ;;  %v1710_v20 = vsel %vm256_vm14, 1.0, %v2074_v38  ;;  %v1711_v0 = vsel %vm257_vm15, 1.0, %v2074_v38  ;;  %1927 = vmatpush1.bf16.msra.mxu1 %v1926_v19  ;;  %vm1163_vm10 = vcmp.eq.f32.partialorder %v2656_v43, %v2297_v32 }
 0x121   :  { %v2746_v62 = vpop.trf.xlu0  ;;  %v1795_v1 = vsel %vm1099_vm11, 1.0, %v2074_v38  ;;  %vm323_vm9 = vcmp.eq.f32.partialorder %v197_v63, %v2303_v33  ;;  %v1713_v25 = vsel %vm259_vm6, 1.0, %v2074_v38  ;;  %vm1162_vm12 = vcmp.eq.f32.partialorder %v2656_v43, %v2253_v28 }
 0x122   :  { %v1794_v27 = vsel %vm1098_vm4, 1.0, %v2074_v38  ;;  %vm322_vm7 = vcmp.eq.f32.partialorder %v197_v63, %v2262_v30  ;;  %v1712_v29 = vsel %vm258_vm13, 1.0, %v2074_v38  ;;  %vm1100_vm14 = vcmp.gt.f32.partialorder %v2693_v56, %v2253_v28  ;;  %v389_v63 = vld [vmem:[#allocation2 + $0xe8] sm:$0xff] }
 0x123   :  { %v2765_v52 = vpop.trf.xlu1  ;;  %vm1101_vm15 = vcmp.gt.f32.partialorder %v2693_v56, %v2297_v32  ;;  %vm1165_vm11 = vcmp.eq.f32.partialorder %v2693_v56, %v2297_v32  ;;  %vm260_vm4 = vcmp.gt.f32.partialorder %v2746_v62, %v2262_v30  ;;  %vm1164_vm6 = vcmp.eq.f32.partialorder %v2693_v56, %v2253_v28 }
 0x124   :  { %v577_v36 = vsel %vm321_vm5, %v385_v26, %v1711_v0  ;;  %v579_v37 = vsel %vm323_vm9, %v387_v14, %v1713_v25  ;;  %v1353_v39 = vsel %vm1161_vm8, %v385_v26, %v1793_v51  ;;  %v1355_v34 = vsel %vm1163_vm10, %v387_v14, %v1795_v1 }
 0x125   :  { %v199_v35 = vpop.trf.xlu0  ;;  %v1864_v40 = vpack.c.bf16 %v579_v37, %v577_v36  ;;  %v1928_v44 = vpack.c.bf16 %v1355_v34, %v1353_v39  ;;  %v576_v45 = vsel %vm320_vm3, %v384_v8, %v1710_v20  ;;  %v578_v46 = vsel %vm322_vm7, %v386_v11, %v1712_v29  ;;  %v393_v34 = vld [vmem:[#allocation2 + $0x108] sm:$0xff] }
 0x126   :  { %vm261_vm13 = vcmp.gt.f32.partialorder %v2746_v62, %v2303_v33  ;;  %v1866_v49 = vpack.c.bf16 %v578_v46, %v576_v45  ;;  %v1352_v48 = vsel %vm1160_vm0, %v384_v8, %v1792_v6  ;;  %v1354_v54 = vsel %vm1162_vm12, %v386_v11, %v1794_v27 }
 0x127   :  { %v2803_v47 = vpop.trf.xlu1  ;;  %v1796_v41 = vsel %vm1100_vm14, 1.0, %v2074_v38  ;;  %v1797_v55 = vsel %vm1101_vm15, 1.0, %v2074_v38  ;;  %1865 = vmatprep.subr.bf16.mxu0 %v1864_v40  ;;  %1929 = vmatprep.subr.bf16.mxu1 %v1928_v44  ;;  %v1930_v57 = vpack.c.bf16 %v1354_v54, %v1352_v48  ;;  %vm1103_vm0 = vcmp.gt.f32.partialorder %v2728_v17, %v2297_v32  ;;  %v395_v40 = vld [vmem:[#allocation2 + $0x118] sm:$0xff]  ;;  %v394_v48 = vld [vmem:[#allocation2 + $0x110] sm:$0xff] }
 0x128   :  { %vm324_vm8 = vcmp.eq.f32.partialorder %v2746_v62, %v2262_v30  ;;  %1867 = vmatpush1.bf16.msra.mxu0 %v1866_v49  ;;  %vm1102_vm3 = vcmp.gt.f32.partialorder %v2728_v17, %v2253_v28  ;;  %vm262_vm5 = vcmp.gt.f32.partialorder %v199_v35, %v2262_v30  ;;  %vm263_vm10 = vcmp.gt.f32.partialorder %v199_v35, %v2303_v33  ;;  %v392_v49 = vld [vmem:[#allocation2 + $0x100] sm:$0xff] }
 0x129   :  { %v2823_v21 = vpop.trf.xlu0  ;;  %vm325_vm9 = vcmp.eq.f32.partialorder %v2746_v62, %v2303_v33  ;;  %v1714_v43 = vsel %vm260_vm4, 1.0, %v2074_v38  ;;  %v1715_v58 = vsel %vm261_vm13, 1.0, %v2074_v38  ;;  %1931 = vmatpush1.bf16.msra.mxu1 %v1930_v57  ;;  %vm1104_vm12 = vcmp.gt.f32.partialorder %v2765_v52, %v2253_v28 }
 0x12a   :  { %vm1167_vm7 = vcmp.eq.f32.partialorder %v2728_v17, %v2297_v32  ;;  %v1799_v60 = vsel %vm1103_vm0, 1.0, %v2074_v38  ;;  %vm327_vm14 = vcmp.eq.f32.partialorder %v199_v35, %v2303_v33  ;;  %v1717_v61 = vsel %vm263_vm10, 1.0, %v2074_v38 }
 0x12b   :  { %v2843_v59 = vpop.trf.xlu1  ;;  %vm1166_vm15 = vcmp.eq.f32.partialorder %v2728_v17, %v2253_v28  ;;  %v1798_v4 = vsel %vm1102_vm3, 1.0, %v2074_v38  ;;  %vm326_vm4 = vcmp.eq.f32.partialorder %v199_v35, %v2262_v30  ;;  %v1716_v5 = vsel %vm262_vm5, 1.0, %v2074_v38 }
 0x12c   :  { %vm1105_vm13 = vcmp.gt.f32.partialorder %v2765_v52, %v2297_v32  ;;  %vm1169_vm0 = vcmp.eq.f32.partialorder %v2765_v52, %v2297_v32  ;;  %v2870_v16 = vsel %vm1104_vm12, 1.0, %v2074_v38  ;;  %vm264_vm3 = vcmp.gt.f32.partialorder %v2823_v21, %v2262_v30 }
 0x12d   :  { %v2860_v13 = vpop.trf.xlu0  ;;  %vm1168_vm5 = vcmp.eq.f32.partialorder %v2765_v52, %v2253_v28  ;;  %v581_v6 = vsel %vm325_vm9, %v389_v63, %v1715_v58  ;;  %v583_v19 = vsel %vm327_vm14, %v391_v3, %v1717_v61  ;;  %v1357_v51 = vsel %vm1165_vm11, %v389_v63, %v1797_v55 }
 0x12e   :  { %v1359_v20 = vsel %vm1167_vm7, %v391_v3, %v1799_v60  ;;  %v1868_v1 = vpack.c.bf16 %v583_v19, %v581_v6  ;;  %v580_v26 = vsel %vm324_vm8, %v388_v7, %v1714_v43  ;;  %v582_v14 = vsel %vm326_vm4, %v390_v10, %v1716_v5 }
 0x12f   :  { %v2887_v0 = vpop.trf.xlu1  ;;  %v1932_v25 = vpack.c.bf16 %v1359_v20, %v1357_v51  ;;  %vm265_vm10 = vcmp.gt.f32.partialorder %v2823_v21, %v2303_v33  ;;  %v1870_v27 = vpack.c.bf16 %v582_v14, %v580_v26  ;;  %v1356_v29 = vsel %vm1164_vm6, %v388_v7, %v1796_v41  ;;  %v396_v14 = vld [vmem:[#allocation2 + $0x120] sm:$0xff] }
 0x130   :  { %v1358_v8 = vsel %vm1166_vm15, %v390_v10, %v1798_v4  ;;  %v1801_v62 = vsel %vm1105_vm13, 1.0, %v2074_v38  ;;  %vm328_vm11 = vcmp.eq.f32.partialorder %v2823_v21, %v2262_v30  ;;  %1869 = vmatprep.subr.bf16.mxu0 %v1868_v1  ;;  %vm1107_vm6 = vcmp.gt.f32.partialorder %v2803_v47, %v2297_v32  ;;  %v397_v1 = vld [vmem:[#allocation2 + $0x128] sm:$0xff] }
 0x131   :  { %v2902_v11 = vpop.trf.xlu0  ;;  %1933 = vmatprep.subr.bf16.mxu1 %v1932_v25  ;;  %v1934_v35 = vpack.c.bf16 %v1358_v8, %v1356_v29  ;;  %vm329_vm8 = vcmp.eq.f32.partialorder %v2823_v21, %v2303_v33  ;;  %1871 = vmatpush1.bf16.msra.mxu0 %v1870_v27  ;;  %vm1106_vm9 = vcmp.gt.f32.partialorder %v2803_v47, %v2253_v28  ;;  %v1718_v17 = vsel %vm264_vm3, 1.0, %v2074_v38  ;;  %v399_v25 = vld [vmem:[#allocation2 + $0x138] sm:$0xff]  ;;  %v398_v27 = vld [vmem:[#allocation2 + $0x130] sm:$0xff] }
 0x132   :  { %vm266_vm12 = vcmp.gt.f32.partialorder %v2860_v13, %v2262_v30  ;;  %vm267_vm7 = vcmp.gt.f32.partialorder %v2860_v13, %v2303_v33  ;;  %v1719_v36 = vsel %vm265_vm10, 1.0, %v2074_v38  ;;  %vm1170_vm14 = vcmp.eq.f32.partialorder %v2803_v47, %v2253_v28 }
 0x133   :  { %v2920_v56 = vpop.trf.xlu1  ;;  %1935 = vmatpush1.bf16.msra.mxu1 %v1934_v35  ;;  %vm1108_vm15 = vcmp.gt.f32.partialorder %v2843_v59, %v2253_v28  ;;  %vm1171_vm4 = vcmp.eq.f32.partialorder %v2803_v47, %v2297_v32  ;;  %v1803_v37 = vsel %vm1107_vm6, 1.0, %v2074_v38  ;;  %vm331_vm13 = vcmp.eq.f32.partialorder %v2860_v13, %v2303_v33 }
 0x134   :  { %v1721_v39 = vsel %vm267_vm7, 1.0, %v2074_v38  ;;  %v1802_v45 = vsel %vm1106_vm9, 1.0, %v2074_v38  ;;  %vm330_vm3 = vcmp.eq.f32.partialorder %v2860_v13, %v2262_v30  ;;  %v1720_v46 = vsel %vm266_vm12, 1.0, %v2074_v38 }
 0x135   :  { %v2940_v44 = vpop.trf.xlu0  ;;  %vm1109_vm10 = vcmp.gt.f32.partialorder %v2843_v59, %v2297_v32  ;;  %vm1173_vm6 = vcmp.eq.f32.partialorder %v2843_v59, %v2297_v32  ;;  %v2957_v54 = vsel %vm1108_vm15, 1.0, %v2074_v38  ;;  %vm268_vm9 = vcmp.gt.f32.partialorder %v2902_v11, %v2262_v30 }
 0x136   :  { %vm269_vm7 = vcmp.gt.f32.partialorder %v2902_v11, %v2303_v33  ;;  %vm1172_vm12 = vcmp.eq.f32.partialorder %v2843_v59, %v2253_v28  ;;  %v585_v55 = vsel %vm329_vm8, %v393_v34, %v1719_v36  ;;  %v587_v57 = vsel %vm331_vm13, %v395_v40, %v1721_v39 }
 0x137   :  { %v2963_v41 = vpop.trf.xlu1  ;;  %v1361_v43 = vsel %vm1169_vm0, %v393_v34, %v1801_v62  ;;  %v1363_v58 = vsel %vm1171_vm4, %v395_v40, %v1803_v37  ;;  %v1872_v60 = vpack.c.bf16 %v587_v57, %v585_v55  ;;  %v584_v63 = vsel %vm328_vm11, %v392_v49, %v1718_v17 }
 0x138   :  { %v1936_v61 = vpack.c.bf16 %v1363_v58, %v1361_v43  ;;  %v586_v3 = vsel %vm330_vm3, %v394_v48, %v1720_v46  ;;  %vm332_vm8 = vcmp.eq.f32.partialorder %v2902_v11, %v2262_v30  ;;  %v1360_v7 = vsel %vm1168_vm5, %v392_v49, %v2870_v16  ;;  %v401_v43 = vld [vmem:[#allocation2 + $0x148] sm:$0xff] }
 0x139   :  { %v2985_v4 = vpop.trf.xlu0  ;;  %v1874_v5 = vpack.c.bf16 %v586_v3, %v584_v63  ;;  %v1362_v21 = vsel %vm1170_vm14, %v394_v48, %v1802_v45  ;;  %v1805_v10 = vsel %vm1109_vm10, 1.0, %v2074_v38  ;;  %1873 = vmatprep.subr.bf16.mxu0 %v1872_v60  ;;  %vm1110_vm0 = vcmp.gt.f32.partialorder %v2887_v0, %v2253_v28  ;;  %v400_v63 = vld [vmem:[#allocation2 + $0x140] sm:$0xff] }
 0x13a   :  { %1937 = vmatprep.subr.bf16.mxu1 %v1936_v61  ;;  %v1938_v13 = vpack.c.bf16 %v1362_v21, %v1360_v7  ;;  %vm1111_vm11 = vcmp.gt.f32.partialorder %v2887_v0, %v2297_v32  ;;  %vm333_vm5 = vcmp.eq.f32.partialorder %v2902_v11, %v2303_v33  ;;  %v1722_v47 = vsel %vm268_vm9, 1.0, %v2074_v38  ;;  %v403_v61 = vld [vmem:[#allocation2 + $0x158] sm:$0xff]  ;;  %v402_v7 = vld [vmem:[#allocation2 + $0x150] sm:$0xff] }
 0x13b   :  { %v3004_v52 = vpop.trf.xlu1  ;;  %1875 = vmatpush1.bf16.msra.mxu0 %v1874_v5  ;;  %vm270_vm14 = vcmp.gt.f32.partialorder %v2940_v44, %v2262_v30  ;;  %vm271_vm15 = vcmp.gt.f32.partialorder %v2940_v44, %v2303_v33  ;;  %v1723_v16 = vsel %vm269_vm7, 1.0, %v2074_v38  ;;  %vm1174_vm4 = vcmp.eq.f32.partialorder %v2887_v0, %v2253_v28 }
 0x13c   :  { %1939 = vmatpush1.bf16.msra.mxu1 %v1938_v13  ;;  %vm1175_vm13 = vcmp.eq.f32.partialorder %v2887_v0, %v2297_v32  ;;  %vm1112_vm3 = vcmp.gt.f32.partialorder %v2920_v56, %v2253_v28  ;;  %v1806_v19 = vsel %vm1110_vm0, 1.0, %v2074_v38  ;;  %v1807_v51 = vsel %vm1111_vm11, 1.0, %v2074_v38 }
 0x13d   :  { %v3026_v6 = vpop.trf.xlu0  ;;  %vm335_vm10 = vcmp.eq.f32.partialorder %v2940_v44, %v2303_v33  ;;  %v1725_v20 = vsel %vm271_vm15, 1.0, %v2074_v38  ;;  %vm334_vm9 = vcmp.eq.f32.partialorder %v2940_v44, %v2262_v30  ;;  %v1724_v26 = vsel %vm270_vm14, 1.0, %v2074_v38 }
 0x13e   :  { %vm1113_vm7 = vcmp.gt.f32.partialorder %v2920_v56, %v2297_v32  ;;  %vm1177_vm0 = vcmp.eq.f32.partialorder %v2920_v56, %v2297_v32  ;;  %vm1176_vm11 = vcmp.eq.f32.partialorder %v2920_v56, %v2253_v28  ;;  %v1808_v8 = vsel %vm1112_vm3, 1.0, %v2074_v38 }
 0x13f   :  { %v3040_v29 = vpop.trf.xlu1  ;;  %vm272_vm14 = vcmp.gt.f32.partialorder %v2985_v4, %v2262_v30  ;;  %vm273_vm15 = vcmp.gt.f32.partialorder %v2985_v4, %v2303_v33  ;;  %vm336_vm2 = vcmp.eq.f32.partialorder %v2985_v4, %v2262_v30  ;;  %v589_v62 = vsel %vm333_vm5, %v397_v1, %v1723_v16 }
 0x140   :  { %v591_v35 = vsel %vm335_vm10, %v399_v25, %v1725_v20  ;;  %v1365_v17 = vsel %vm1173_vm6, %v397_v1, %v1805_v10  ;;  %v1367_v36 = vsel %vm1175_vm13, %v399_v25, %v1807_v51  ;;  %v588_v40 = vsel %vm332_vm8, %v396_v14, %v1722_v47 }
 0x141   :  { %v3066_v37 = vpop.trf.xlu0  ;;  %v1876_v39 = vpack.c.bf16 %v591_v35, %v589_v62  ;;  %v1940_v34 = vpack.c.bf16 %v1367_v36, %v1365_v17  ;;  %v590_v45 = vsel %vm334_vm9, %v398_v27, %v1724_v26  ;;  %v1364_v49 = vsel %vm1172_vm12, %v396_v14, %v2957_v54  ;;  %v405_v17 = vld [vmem:[#allocation2 + $0x168] sm:$0xff] }
 0x142   :  { %v1878_v46 = vpack.c.bf16 %v590_v45, %v588_v40  ;;  %v1366_v48 = vsel %vm1174_vm4, %v398_v27, %v1806_v19  ;;  %vm1114_vm6 = vcmp.gt.f32.partialorder %v2963_v41, %v2253_v28  ;;  %v1809_v11 = vsel %vm1113_vm7, 1.0, %v2074_v38  ;;  %v404_v40 = vld [vmem:[#allocation2 + $0x160] sm:$0xff] }
 0x143   :  { %v3083_v55 = vpop.trf.xlu1  ;;  %vm337_vm8 = vcmp.eq.f32.partialorder %v2985_v4, %v2303_v33  ;;  %1877 = vmatprep.subr.bf16.mxu0 %v1876_v39  ;;  %1941 = vmatprep.subr.bf16.mxu1 %v1940_v34  ;;  %v1942_v59 = vpack.c.bf16 %v1366_v48, %v1364_v49  ;;  %vm1115_vm12 = vcmp.gt.f32.partialorder %v2963_v41, %v2297_v32  ;;  %v1726_v0 = vsel %vm272_vm14, 1.0, %v2074_v38  ;;  %v407_v34 = vld [vmem:[#allocation2 + $0x178] sm:$0xff]  ;;  %v406_v48 = vld [vmem:[#allocation2 + $0x170] sm:$0xff] }
 0x144   :  { %v1727_v44 = vsel %vm273_vm15, 1.0, %v2074_v38  ;;  %1879 = vmatpush1.bf16.msra.mxu0 %v1878_v46  ;;  %vm274_vm5 = vcmp.gt.f32.partialorder %v3026_v6, %v2262_v30  ;;  %vm275_vm4 = vcmp.gt.f32.partialorder %v3026_v6, %v2303_v33  ;;  %vm1178_vm13 = vcmp.eq.f32.partialorder %v2963_v41, %v2253_v28 }
 0x145   :  { %v3105_v54 = vpop.trf.xlu0  ;;  %1943 = vmatpush1.bf16.msra.mxu1 %v1942_v59  ;;  %vm1179_vm3 = vcmp.eq.f32.partialorder %v2963_v41, %v2297_v32  ;;  %v1810_v57 = vsel %vm1114_vm6, 1.0, %v2074_v38  ;;  %vm1116_vm10 = vcmp.gt.f32.partialorder %v3004_v52, %v2253_v28  ;;  %v1811_v58 = vsel %vm1115_vm12, 1.0, %v2074_v38 }
 0x146   :  { %vm339_vm9 = vcmp.eq.f32.partialorder %v3026_v6, %v2303_v33  ;;  %v1729_v60 = vsel %vm275_vm4, 1.0, %v2074_v38  ;;  %vm1117_vm7 = vcmp.gt.f32.partialorder %v3004_v52, %v2297_v32  ;;  %vm338_vm14 = vcmp.eq.f32.partialorder %v3026_v6, %v2262_v30 }
 0x147   :  { %v1728_v3 = vsel %vm274_vm5, 1.0, %v2074_v38  ;;  %vm1181_vm15 = vcmp.eq.f32.partialorder %v3004_v52, %v2297_v32  ;;  %v3132_v5 = vsel %vm1116_vm10, 1.0, %v2074_v38  ;;  %vm1180_vm6 = vcmp.eq.f32.partialorder %v3004_v52, %v2253_v28  ;;  %v3146_v47 = vpop.trf.xlu1 }
 0x148   :  { %v1813_v21 = vsel %vm1117_vm7, 1.0, %v2074_v38  ;;  %vm276_vm12 = vcmp.gt.f32.partialorder %v3066_v37, %v2262_v30  ;;  %vm277_vm4 = vcmp.gt.f32.partialorder %v3066_v37, %v2303_v33  ;;  %v593_v10 = vsel %vm337_vm8, %v401_v43, %v1727_v44 }
 0x149   :  { %v3144_v13 = vpop.trf.xlu0  ;;  %v595_v16 = vsel %vm339_vm9, %v403_v61, %v1729_v60  ;;  %v1369_v19 = vsel %vm1177_vm0, %v401_v43, %v1809_v11  ;;  %v1371_v51 = vsel %vm1179_vm3, %v403_v61, %v1811_v58  ;;  %v592_v20 = vsel %vm336_vm2, %v400_v63, %v1726_v0 }
 0x14a   :  { %v1880_v1 = vpack.c.bf16 %v595_v16, %v593_v10  ;;  %v1944_v25 = vpack.c.bf16 %v1371_v51, %v1369_v19  ;;  %v594_v26 = vsel %vm338_vm14, %v402_v7, %v1728_v3  ;;  %v1368_v14 = vsel %vm1176_vm11, %v400_v63, %v1808_v8  ;;  %v409_v16 = vld [vmem:[#allocation2 + $0x188] sm:$0xff] }
 0x14b   :  { %v1882_v27 = vpack.c.bf16 %v594_v26, %v592_v20  ;;  %v1370_v62 = vsel %vm1178_vm13, %v402_v7, %v1810_v57  ;;  %vm1118_vm0 = vcmp.gt.f32.partialorder %v3040_v29, %v2253_v28  ;;  %vm1119_vm2 = vcmp.gt.f32.partialorder %v3040_v29, %v2297_v32  ;;  %v3205_v36 = vpop.trf.xlu1  ;;  %v411_v20 = vld [vmem:[#allocation2 + $0x198] sm:$0xff] }
 0x14c   :  { %vm340_vm8 = vcmp.eq.f32.partialorder %v3066_v37, %v2262_v30  ;;  %vm341_vm5 = vcmp.eq.f32.partialorder %v3066_v37, %v2303_v33  ;;  %v1730_v56 = vsel %vm276_vm12, 1.0, %v2074_v38  ;;  %1881 = vmatprep.subr.bf16.mxu0 %v1880_v1  ;;  %1945 = vmatprep.subr.bf16.mxu1 %v1944_v25  ;;  %v1946_v41 = vpack.c.bf16 %v1370_v62, %v1368_v14  ;;  %v408_v1 = vld [vmem:[#allocation2 + $0x180] sm:$0xff]  ;;  %v410_v14 = vld [vmem:[#allocation2 + $0x190] sm:$0xff] }
 0x14d   :  { %v3181_v4 = vpop.trf.xlu0  ;;  %v1731_v6 = vsel %vm277_vm4, 1.0, %v2074_v38  ;;  %1883 = vmatpush1.bf16.msra.mxu0 %v1882_v27  ;;  %vm1182_vm11 = vcmp.eq.f32.partialorder %v3040_v29, %v2253_v28  ;;  %vm278_vm13 = vcmp.gt.f32.partialorder %v3105_v54, %v2262_v30  ;;  %vm279_vm3 = vcmp.gt.f32.partialorder %v3105_v54, %v2303_v33 }
 0x14e   :  { %1947 = vmatpush1.bf16.msra.mxu1 %v1946_v41  ;;  %vm1183_vm10 = vcmp.eq.f32.partialorder %v3040_v29, %v2297_v32  ;;  %v1814_v8 = vsel %vm1118_vm0, 1.0, %v2074_v38  ;;  %v1815_v35 = vsel %vm1119_vm2, 1.0, %v2074_v38  ;;  %vm1120_vm9 = vcmp.gt.f32.partialorder %v3083_v55, %v2253_v28 }
 0x14f   :  { %vm342_vm7 = vcmp.eq.f32.partialorder %v3105_v54, %v2262_v30  ;;  %vm343_vm14 = vcmp.eq.f32.partialorder %v3105_v54, %v2303_v33  ;;  %v1733_v39 = vsel %vm279_vm3, 1.0, %v2074_v38  ;;  %vm1121_vm12 = vcmp.gt.f32.partialorder %v3083_v55, %v2297_v32  ;;  %v3260_v37 = vpop.trf.xlu1 }
 0x150   :  { %v1732_v45 = vsel %vm278_vm13, 1.0, %v2074_v38  ;;  %vm1185_vm4 = vcmp.eq.f32.partialorder %v3083_v55, %v2297_v32  ;;  %v3218_v46 = vsel %vm1120_vm9, 1.0, %v2074_v38  ;;  %v1817_v49 = vsel %vm1121_vm12, 1.0, %v2074_v38 }
 0x151   :  { %v3221_v11 = vpop.trf.xlu0  ;;  %vm1184_vm0 = vcmp.eq.f32.partialorder %v3083_v55, %v2253_v28  ;;  %vm280_vm2 = vcmp.gt.f32.partialorder %v3144_v13, %v2262_v30  ;;  %vm281_vm13 = vcmp.gt.f32.partialorder %v3144_v13, %v2303_v33  ;;  %vm344_vm3 = vcmp.eq.f32.partialorder %v3144_v13, %v2262_v30 }
 0x152   :  { %v597_v59 = vsel %vm341_vm5, %v405_v17, %v1731_v6  ;;  %v599_v0 = vsel %vm343_vm14, %v407_v34, %v1733_v39  ;;  %v1373_v44 = vsel %vm1181_vm15, %v405_v17, %v1813_v21  ;;  %v1375_v57 = vsel %vm1183_vm10, %v407_v34, %v1815_v35 }
 0x153   :  { %v596_v43 = vsel %vm340_vm8, %v404_v40, %v1730_v56  ;;  %v1884_v58 = vpack.c.bf16 %v599_v0, %v597_v59  ;;  %v1948_v60 = vpack.c.bf16 %v1375_v57, %v1373_v44  ;;  %v598_v61 = vsel %vm342_vm7, %v406_v48, %v1732_v45  ;;  %v3319_v62 = vpop.trf.xlu1 }
 0x154   :  { %v1372_v63 = vsel %vm1180_vm6, %v404_v40, %v3132_v5  ;;  %v1886_v3 = vpack.c.bf16 %v598_v61, %v596_v43  ;;  %v1374_v7 = vsel %vm1182_vm11, %v406_v48, %v1814_v8  ;;  %vm1122_vm15 = vcmp.gt.f32.partialorder %v3146_v47, %v2253_v28  ;;  %v413_v48 = vld [vmem:[#allocation2 + $0x1a8] sm:$0xff]  ;;  %v415_v43 = vld [vmem:[#allocation2 + $0x1b8] sm:$0xff]  ;;  %v414_v61 = vld [vmem:[#allocation2 + $0x1b0] sm:$0xff] }
 0x155   :  { %vm1123_vm8 = vcmp.gt.f32.partialorder %v3146_v47, %v2297_v32  ;;  %vm345_vm5 = vcmp.eq.f32.partialorder %v3144_v13, %v2303_v33  ;;  %v1734_v52 = vsel %vm280_vm2, 1.0, %v2074_v38  ;;  %v1735_v29 = vsel %vm281_vm13, 1.0, %v2074_v38  ;;  %1885 = vmatprep.subr.bf16.mxu0 %v1884_v58  ;;  %1949 = vmatprep.subr.bf16.mxu1 %v1948_v60  ;;  %v3280_v5 = vpop.trf.xlu0  ;;  %v412_v58 = vld [vmem:[#allocation2 + $0x1a0] sm:$0xff] }
 0x156   :  { %v1950_v54 = vpack.c.bf16 %v1374_v7, %v1372_v63  ;;  %1887 = vmatpush1.bf16.msra.mxu0 %v1886_v3  ;;  %vm1186_vm6 = vcmp.eq.f32.partialorder %v3146_v47, %v2253_v28  ;;  %vm1187_vm11 = vcmp.eq.f32.partialorder %v3146_v47, %v2297_v32  ;;  %vm282_vm10 = vcmp.gt.f32.partialorder %v3181_v4, %v2262_v30 }
 0x157   :  { %vm283_vm9 = vcmp.gt.f32.partialorder %v3181_v4, %v2303_v33  ;;  %v1818_v21 = vsel %vm1122_vm15, 1.0, %v2074_v38  ;;  %v1819_v10 = vsel %vm1123_vm8, 1.0, %v2074_v38  ;;  %vm346_vm7 = vcmp.eq.f32.partialorder %v3181_v4, %v2262_v30  ;;  %v3373_v59 = vpop.trf.xlu1 }
 0x158   :  { %1951 = vmatpush1.bf16.msra.mxu1 %v1950_v54  ;;  %vm1124_vm14 = vcmp.gt.f32.partialorder %v3205_v36, %v2253_v28  ;;  %vm347_vm12 = vcmp.eq.f32.partialorder %v3181_v4, %v2303_v33  ;;  %v1736_v19 = vsel %vm282_vm10, 1.0, %v2074_v38  ;;  %v1737_v51 = vsel %vm283_vm9, 1.0, %v2074_v38 }
 0x159   :  { %vm1125_vm2 = vcmp.gt.f32.partialorder %v3205_v36, %v2297_v32  ;;  %vm1189_vm13 = vcmp.eq.f32.partialorder %v3205_v36, %v2297_v32  ;;  %v3303_v25 = vsel %vm1124_vm14, 1.0, %v2074_v38  ;;  %vm284_vm15 = vcmp.gt.f32.partialorder %v3221_v11, %v2262_v30  ;;  %v3340_v40 = vpop.trf.xlu0 }
 0x15a   :  { %v1821_v26 = vsel %vm1125_vm2, 1.0, %v2074_v38  ;;  %vm1188_vm8 = vcmp.eq.f32.partialorder %v3205_v36, %v2253_v28  ;;  %vm285_vm10 = vcmp.gt.f32.partialorder %v3221_v11, %v2303_v33  ;;  %vm348_vm9 = vcmp.eq.f32.partialorder %v3221_v11, %v2262_v30 }
 0x15b   :  { %vm349_vm1 = vcmp.eq.f32.partialorder %v3221_v11, %v2303_v33  ;;  %v601_v27 = vsel %vm345_vm5, %v409_v16, %v1735_v29  ;;  %v603_v56 = vsel %vm347_vm12, %v411_v20, %v1737_v51  ;;  %v1377_v41 = vsel %vm1185_vm4, %v409_v16, %v1817_v49  ;;  %v3426_v11 = vpop.trf.xlu1 }
 0x15c   :  { %v1379_v6 = vsel %vm1187_vm11, %v411_v20, %v1819_v10  ;;  %v600_v8 = vsel %vm344_vm3, %v408_v1, %v1734_v52  ;;  %v1888_v35 = vpack.c.bf16 %v603_v56, %v601_v27  ;;  %v602_v39 = vsel %vm346_vm7, %v410_v14, %v1736_v19  ;;  %v417_v56 = vld [vmem:[#allocation2 + $0x1c8] sm:$0xff] }
 0x15d   :  { %v1952_v17 = vpack.c.bf16 %v1379_v6, %v1377_v41  ;;  %v1376_v34 = vsel %vm1184_vm0, %v408_v1, %v3218_v46  ;;  %v1890_v45 = vpack.c.bf16 %v602_v39, %v600_v8  ;;  %v1378_v49 = vsel %vm1186_vm6, %v410_v14, %v1818_v21  ;;  %v229_v63 = vpop.trf.xlu0  ;;  %v419_v6 = vld [vmem:[#allocation2 + $0x1d8] sm:$0xff]  ;;  %v416_v8 = vld [vmem:[#allocation2 + $0x1c0] sm:$0xff] }
 0x15e   :  { %vm1126_vm4 = vcmp.gt.f32.partialorder %v3260_v37, %v2253_v28  ;;  %vm1127_vm3 = vcmp.gt.f32.partialorder %v3260_v37, %v2297_v32  ;;  %v1738_v13 = vsel %vm284_vm15, 1.0, %v2074_v38  ;;  %v1739_v55 = vsel %vm285_vm10, 1.0, %v2074_v38  ;;  %1889 = vmatprep.subr.bf16.mxu0 %v1888_v35 }
 0x15f   :  { %1953 = vmatprep.subr.bf16.mxu1 %v1952_v17  ;;  %v1954_v47 = vpack.c.bf16 %v1378_v49, %v1376_v34  ;;  %vm1190_vm0 = vcmp.eq.f32.partialorder %v3260_v37, %v2253_v28  ;;  %1891 = vmatpush1.bf16.msra.mxu0 %v1890_v45  ;;  %vm1191_vm5 = vcmp.eq.f32.partialorder %v3260_v37, %v2297_v32  ;;  %v1822_v4 = vsel %vm1126_vm4, 1.0, %v2074_v38  ;;  %v418_v17 = vld [vmem:[#allocation2 + $0x1d0] sm:$0xff]  ;;  %v1071_v49 = vpop.trf.xlu1 }
 0x160   :  { %vm286_vm6 = vcmp.gt.f32.partialorder %v3280_v5, %v2262_v30  ;;  %vm287_vm11 = vcmp.gt.f32.partialorder %v3280_v5, %v2303_v33  ;;  %v1823_v46 = vsel %vm1127_vm3, 1.0, %v2074_v38  ;;  %vm350_vm7 = vcmp.eq.f32.partialorder %v3280_v5, %v2262_v30 }
 0x161   :  { %1955 = vmatpush1.bf16.msra.mxu1 %v1954_v47  ;;  %vm351_vm14 = vcmp.eq.f32.partialorder %v3280_v5, %v2303_v33  ;;  %vm1128_vm12 = vcmp.gt.f32.partialorder %v3319_v62, %v2253_v28  ;;  %v1740_v0 = vsel %vm286_vm6, 1.0, %v2074_v38  ;;  %v1741_v44 = vsel %vm287_vm11, 1.0, %v2074_v38 }
 0x162   :  { %vm1129_vm2 = vcmp.gt.f32.partialorder %v3319_v62, %v2297_v32  ;;  %v3380_v57 = vsel %vm1128_vm12, 1.0, %v2074_v38  ;;  %vm1193_vm15 = vcmp.eq.f32.partialorder %v3319_v62, %v2297_v32  ;;  %vm288_vm10 = vcmp.gt.f32.partialorder %v3340_v40, %v2262_v30 }
 0x163   :  { %v1825_v60 = vsel %vm1129_vm2, 1.0, %v2074_v38  ;;  %vm289_vm4 = vcmp.gt.f32.partialorder %v3340_v40, %v2303_v33  ;;  %vm352_vm3 = vcmp.eq.f32.partialorder %v3340_v40, %v2262_v30  ;;  %vm1192_vm6 = vcmp.eq.f32.partialorder %v3319_v62, %v2253_v28 }
 0x164   :  { %vm353_vm11 = vcmp.eq.f32.partialorder %v3340_v40, %v2303_v33  ;;  %v1742_v3 = vsel %vm288_vm10, 1.0, %v2074_v38  ;;  %v1743_v7 = vsel %vm289_vm4, 1.0, %v2074_v38  ;;  %v605_v52 = vsel %vm349_vm1, %v413_v48, %v1739_v55  ;;  %v421_v40 = vld [vmem:[#allocation2 + $0x1e8] sm:$0xff] }
 0x165   :  { %v607_v29 = vsel %vm351_vm14, %v415_v43, %v1741_v44  ;;  %v1381_v54 = vsel %vm1189_vm13, %v413_v48, %v1821_v26  ;;  %v1383_v21 = vsel %vm1191_vm5, %v415_v43, %v1823_v46  ;;  %v604_v10 = vsel %vm348_vm9, %v412_v58, %v1738_v13 }
 0x166   :  { %v1892_v16 = vpack.c.bf16 %v607_v29, %v605_v52  ;;  %v1956_v19 = vpack.c.bf16 %v1383_v21, %v1381_v54  ;;  %v606_v51 = vsel %vm350_vm7, %v414_v61, %v1740_v0  ;;  %v1380_v20 = vsel %vm1188_vm8, %v412_v58, %v3303_v25  ;;  %v230_v25 = vpop.trf.xlu0 }
 0x167   :  { %v1894_v1 = vpack.c.bf16 %v606_v51, %v604_v10  ;;  %v1382_v26 = vsel %vm1190_vm0, %v414_v61, %v1822_v4  ;;  %vm1130_vm1 = vcmp.gt.f32.partialorder %v3373_v59, %v2253_v28  ;;  %vm1131_vm13 = vcmp.gt.f32.partialorder %v3373_v59, %v2297_v32 }
 0x168   :  { %1893 = vmatprep.subr.bf16.mxu0 %v1892_v16  ;;  %1957 = vmatprep.subr.bf16.mxu1 %v1956_v19  ;;  %v1958_v5 = vpack.c.bf16 %v1382_v26, %v1380_v20  ;;  %vm1194_vm9 = vcmp.eq.f32.partialorder %v3373_v59, %v2253_v28  ;;  %vm1195_vm8 = vcmp.eq.f32.partialorder %v3373_v59, %v2297_v32  ;;  %v1826_v36 = vsel %vm1130_vm1, 1.0, %v2074_v38  ;;  %v47_v26 = vld [vmem:[%s3711_s4] sm:$0xff] }
 0x169   :  { %1895 = vmatpush1.bf16.msra.mxu0 %v1894_v1  ;;  %v1827_v37 = vsel %vm1131_vm13, 1.0, %v2074_v38  ;;  %vm290_vm0 = vcmp.gt.f32.partialorder %v229_v63, %v2262_v30  ;;  %vm291_vm5 = vcmp.gt.f32.partialorder %v229_v63, %v2303_v33  ;;  %vm354_vm7 = vcmp.eq.f32.partialorder %v229_v63, %v2262_v30 }
 0x16a   :  { %1959 = vmatpush1.bf16.msra.mxu1 %v1958_v5  ;;  %vm355_vm14 = vcmp.eq.f32.partialorder %v229_v63, %v2303_v33  ;;  %v1744_v14 = vsel %vm290_vm0, 1.0, %v2074_v38  ;;  %v1745_v27 = vsel %vm291_vm5, 1.0, %v2074_v38  ;;  %vm1132_vm12 = vcmp.gt.f32.partialorder %v3426_v11, %v2253_v28  ;;  %v231_v43 = vpop.trf.xlu0  ;;  %v420_v63 = vld [vmem:[#allocation2 + $0x1e0] sm:$0xff] }
 0x16b   :  { %vm1133_vm2 = vcmp.gt.f32.partialorder %v3426_v11, %v2297_v32  ;;  %vm1196_vm10 = vcmp.eq.f32.partialorder %v3426_v11, %v2253_v28  ;;  %vm1197_vm4 = vcmp.eq.f32.partialorder %v3426_v11, %v2297_v32  ;;  %v1828_v41 = vsel %vm1132_vm12, 1.0, %v2074_v38  ;;  %v1765_v11 = vld [vmem:[%s3710_s3 + $0x8] sm:$0xff] }
 0x16c   :  { %v1829_v35 = vsel %vm1133_vm2, 1.0, %v2074_v38  ;;  %vm292_vm1 = vcmp.gt.f32.partialorder %v230_v25, %v2262_v30  ;;  %vm293_vm13 = vcmp.gt.f32.partialorder %v230_v25, %v2303_v33  ;;  %vm356_vm0 = vcmp.eq.f32.partialorder %v230_v25, %v2262_v30 }
 0x16d   :  { %vm357_vm5 = vcmp.eq.f32.partialorder %v230_v25, %v2303_v33  ;;  %v1746_v39 = vsel %vm292_vm1, 1.0, %v2074_v38  ;;  %v1747_v34 = vsel %vm293_vm13, 1.0, %v2074_v38  ;;  %v609_v45 = vsel %vm353_vm11, %v417_v56, %v1743_v7 }
 0x16e   :  { %v611_v13 = vsel %vm355_vm14, %v419_v6, %v1745_v27  ;;  %v1385_v55 = vsel %vm1193_vm15, %v417_v56, %v1825_v60  ;;  %v1387_v47 = vsel %vm1195_vm8, %v419_v6, %v1827_v37  ;;  %v608_v4 = vsel %vm352_vm3, %v416_v8, %v1742_v3  ;;  %v422_v3 = vld [vmem:[#allocation2 + $0x1f0] sm:$0xff] }
 0x16f   :  { %v1896_v46 = vpack.c.bf16 %v611_v13, %v609_v45  ;;  %v1960_v48 = vpack.c.bf16 %v1387_v47, %v1385_v55  ;;  %v610_v0 = vsel %vm354_vm7, %v418_v17, %v1744_v14  ;;  %v1384_v44 = vsel %vm1192_vm6, %v416_v8, %v3380_v57  ;;  %v423_v57 = vld [vmem:[#allocation2 + $0x1f8] sm:$0xff] }
 0x170   :  { %v1898_v58 = vpack.c.bf16 %v610_v0, %v608_v4  ;;  %v1386_v60 = vsel %vm1194_vm9, %v418_v17, %v1826_v36  ;;  %vm1134_vm15 = vcmp.gt.f32.partialorder %v1071_v49, %v2253_v28  ;;  %vm1135_vm3 = vcmp.gt.f32.partialorder %v1071_v49, %v2297_v32  ;;  %v1766_v36 = vld [vmem:[%s3711_s4 + $0x8] sm:$0xff] }
 0x171   :  { %1897 = vmatprep.subr.bf16.mxu0 %v1896_v46  ;;  %1961 = vmatprep.subr.bf16.mxu1 %v1960_v48  ;;  %v1962_v61 = vpack.c.bf16 %v1386_v60, %v1384_v44  ;;  %vm1198_vm11 = vcmp.eq.f32.partialorder %v1071_v49, %v2253_v28  ;;  %vm1199_vm8 = vcmp.eq.f32.partialorder %v1071_v49, %v2297_v32  ;;  %v1830_v62 = vsel %vm1134_vm15, 1.0, %v2074_v38 }
 0x172   :  { %1899 = vmatpush1.bf16.msra.mxu0 %v1898_v58  ;;  %v1831_v59 = vsel %vm1135_vm3, 1.0, %v2074_v38  ;;  %vm294_vm6 = vcmp.gt.f32.partialorder %v231_v43, %v2262_v30  ;;  %vm295_vm9 = vcmp.gt.f32.partialorder %v231_v43, %v2303_v33  ;;  %vm358_vm7 = vcmp.eq.f32.partialorder %v231_v43, %v2262_v30 }
 0x173   :  { %1963 = vmatpush1.bf16.msra.mxu1 %v1962_v61  ;;  %vm359_vm14 = vcmp.eq.f32.partialorder %v231_v43, %v2303_v33  ;;  %v1748_v7 = vsel %vm294_vm6, 1.0, %v2074_v38  ;;  %v1749_v52 = vsel %vm295_vm9, 1.0, %v2074_v38  ;;  %v613_v29 = vsel %vm357_vm5, %v421_v40, %v1747_v34  ;;  %v46_v33 = vld [vmem:[%s3710_s3] sm:$0xff] }
 0x174   :  { %v615_v54 = vsel %vm359_vm14, %v423_v57, %v1749_v52  ;;  %v1389_v21 = vsel %vm1197_vm4, %v421_v40, %v1829_v35  ;;  %v1391_v10 = vsel %vm1199_vm8, %v423_v57, %v1831_v59  ;;  %v612_v16 = vsel %vm356_vm0, %v420_v63, %v1746_v39 }
 0x175   :  { %v1900_v19 = vpack.c.bf16 %v615_v54, %v613_v29  ;;  %v1964_v51 = vpack.c.bf16 %v1391_v10, %v1389_v21  ;;  %v614_v20 = vsel %vm358_vm7, %v422_v3, %v1748_v7  ;;  %v1388_v1 = vsel %vm1196_vm10, %v420_v63, %v1828_v41 }
 0x176   :  { %v1902_v32 = vpack.c.bf16 %v614_v20, %v612_v16  ;;  %v1390_v30 = vsel %vm1198_vm11, %v422_v3, %v1830_v62  ;;  %vm129_vm12 = vcmask 1040384   ;;  %vm3716_vm2 = vcmp.gt.s32.totalorder %v2227_v42, 0 }
 0x177   :  { %v3514_v5 = vsel %vm3716_vm2, 1.0, %v2074_v38  ;;  %1901 = vmatprep.subr.bf16.mxu0 %v1900_v19  ;;  %1965 = vmatprep.subr.bf16.mxu1 %v1964_v51  ;;  %v1966_v37 = vpack.c.bf16 %v1390_v30, %v1388_v1  ;;  %vm3717_vm10 = vcmp.gt.s32.totalorder %v2250_v53, 0  ;;  %v815_v27 = vsub.f32 %v46_v33, %v47_v26 }
 0x178   :  { %v963_v28 = vrot.slane %v3514_v5, %v2237_v24  ;;  %v967_v25 = vrot.slane %v3514_v5, %v2292_v31  ;;  %v3529_v14 = vsel %vm3717_vm10, 1.0, %v2074_v38  ;;  %1903 = vmatpush1.bf16.msra.mxu0 %v1902_v32  ;;  %v1591_v35 = vsub.f32 %v1765_v11, %v1766_v36 }
 0x179   :  { %v122_v56 = vrot.slane %v3529_v14, %v2237_v24  ;;  %v126_v41 = vrot.slane %v3529_v14, %v2292_v31  ;;  %1967 = vmatpush1.bf16.msra.mxu1 %v1966_v37  ;;  %v816_v39 = vand.u32 2147483647, %v815_v27  ;;  %v818_v34 = vmul.f32 0.5, %v815_v27 }
 0x17a   :  { %v970_v6 = vsel %vm129_vm12, %v963_v28, 0.0  ;;  %v971_v8 = vsel %vm129_vm12, %v967_v25, 0.0  ;;  %vm825_vm4 = vcmask 1043456   ;;  %v1592_v13 = vand.u32 2147483647, %v1591_v35 }
 0x17b   :  { %v972_v17 = vadd.f32 %v971_v8, %v970_v6  ;;  %v130_v45 = vsel %vm129_vm12, %v122_v56, 0.0  ;;  %681 = vmatmul.mubr.f32.vlgmr.msra.gmra.mrb[0].mxu0 %v2075_v50  ;;  %v131_v49 = vsel %vm129_vm12, %v126_v41, 0.0  ;;  %v1594_v55 = vmul.f32 0.5, %v1591_v35 }
 0x17c   :  { %1457 = vmatmul.mubr.f32.vlgmr.msra.gmra.mrb[0].mxu1 %v2075_v50  ;;  %vm817_vm1 = vcmp.lt.f32.partialorder %v816_v39, 1.0  ;;  %v819_v47 = vmul.f32 %v818_v34, %v815_v27  ;;  %v1757_v4 = vadd.f32 -0.5, %v816_v39  ;;  %v132_v46 = vadd.f32 %v131_v49, %v130_v45 }
 0x17d   :  { %973 = vadd.xlane.f32.xlu1 %v972_v17  ;;  %vm1593_vm13 = vcmp.lt.f32.partialorder %v1592_v13, 1.0  ;;  %v1595_v48 = vmul.f32 %v1594_v55, %v1591_v35  ;;  %v1839_v0 = vadd.f32 -0.5, %v1592_v13 }
 0x17e   :  { %v821_v44 = vsel %vm817_vm1, %v819_v47, %v1757_v4  ;;  %133 = vadd.xlane.f32.xlu0 %v132_v46 }
 0x17f   :  { %v823_v43 = vcombine.high %v821_v44, %v821_v44  ;;  %v826_v58 = vsel %vm825_vm4, %v821_v44, 0.0  ;;  %v1597_v60 = vsel %vm1593_vm13, %v1595_v48, %v1839_v0 }
 0x180   :  { %v827_v40 = vrot.slane %v826_v58, 4  ;;  %v1599_v61 = vcombine.high %v1597_v60, %v1597_v60  ;;  %v1601_v62 = vsel %vm825_vm4, %v1597_v60, 0.0  ;;  %v2009_v60 = vld [vmem:[%s3709_s2] sm:$0x3] }
 0x181   :  { %v833_v50 = vsel %vm825_vm4, %v823_v43, 0.0  ;;  %v1602_v57 = vrot.slane %v1601_v62, 4  ;;  %v37_v43 = vadd.s32 8, %v2209_v9 }
 0x182   :  { %v828_v63 = vadd.f32 %v827_v40, %v826_v58  ;;  %v834_v59 = vrot.slane %v833_v50, 4  ;;  %v1608_v3 = vsel %vm825_vm4, %v1599_v61, 0.0  ;;  %v38_v58 = vadd.s32 16, %v2209_v9 }
 0x183   :  { %v1603_v7 = vadd.f32 %v1602_v57, %v1601_v62  ;;  %v1609_v52 = vrot.slane %v1608_v3, 4  ;;  %v713_v40 = vrot.slane %v2009_v60, %v2237_v24  ;;  %v717_v61 = vrot.slane %v2009_v60, %v2292_v31  ;;  %v2010_v62 = vld [vmem:[%s3708_s1 + $0x30] sm:$0xff]  ;;  %v2011_v57 = vld [vmem:[%s3708_s1 + $0x38] sm:$0xff] }
 0x184   :  { %v829_v29 = vrot.slane %v828_v63, 2  ;;  %v835_v54 = vadd.f32 %v834_v59, %v833_v50  ;;  %v950_v50 = vsub.f32 %v2010_v62, %v2212_v15  ;;  %v2012_v59 = vld [vmem:[%s3708_s1 + $0x40] sm:$0xff]  ;;  %vm3718_vm4 = vcmask 1044480  }
 0x185   :  { %v1604_v21 = vrot.slane %v1603_v7, 2  ;;  %v1610_v10 = vadd.f32 %v1609_v52, %v1608_v3  ;;  %v952_v3 = vsub.f32 %v2012_v59, %v2212_v15  ;;  %vm718_vm6 = vcmp.eq.s32.totalorder %v2209_v9, %v713_v40  ;;  %vm3719_vm1 = vmmov %vm3718_vm4 }
 0x186   :  { %v830_v16 = vadd.f32 %v829_v29, %v828_v63  ;;  %v836_v19 = vrot.slane %v835_v54, 2  ;;  %v951_v63 = vsub.f32 %v2011_v57, %v2215_v12  ;;  %v2014_v29 = vld [vmem:[%s3708_s1 + $0x50] sm:$0x1f]  ;;  %vm719_vm9 = vcmp.eq.s32.totalorder %v2209_v9, %v717_v61  ;;  %vm3720_vm13 = vmmov %vm3719_vm1 }
 0x187   :  { %v1605_v51 = vadd.f32 %v1604_v21, %v1603_v7  ;;  %v1611_v20 = vrot.slane %v1610_v10, 2  ;;  %v2013_v7 = vld [vmem:[%s3708_s1 + $0x48] sm:$0xff]  ;;  %v2015_v21 = vld [vmem:[%s3708_s1 + $0x58] sm:$0x1f]  ;;  %vm720_vm7 = vcmp.eq.s32.totalorder %v37_v43, %v713_v40  ;;  %vm721_vm14 = vcmp.eq.s32.totalorder %v37_v43, %v717_v61 }
 0x188   :  { %v831_v1 = vrot.slane %v830_v16, 1  ;;  %v837_v33 = vadd.f32 %v836_v19, %v835_v54  ;;  %v953_v52 = vsub.f32 %v2013_v7, %v2215_v12  ;;  %v954_v54 = vsub.f32 %v2014_v29, %v2212_v15  ;;  %v2016_v15 = vld [vmem:[%s3708_s1] sm:$0xff] }
 0x189   :  { %v1606_v26 = vrot.slane %v1605_v51, 1  ;;  %v1612_v32 = vadd.f32 %v1611_v20, %v1610_v10  ;;  %v955_v10 = vsub.f32 %v2015_v21, %v2215_v12  ;;  %v109_v12 = vsub.f32 %v2016_v15, %v2230_v22 }
 0x18a   :  { %v832_v30 = vadd.f32 %v831_v1, %v830_v16  ;;  %v838_v11 = vrot.slane %v837_v33, 1  ;;  %vm722_vm2 = vcmp.eq.s32.totalorder %v38_v58, %v713_v40  ;;  %vm723_vm10 = vcmp.eq.s32.totalorder %v38_v58, %v717_v61  ;;  %v2018_v1 = vld [vmem:[%s3708_s1 + $0x10] sm:$0xff] }
 0x18b   :  { %v1607_v36 = vadd.f32 %v1606_v26, %v1605_v51  ;;  %v1613_v37 = vrot.slane %v1612_v32, 1  ;;  %v2017_v51 = vld [vmem:[%s3708_s1 + $0x8] sm:$0xff]  ;;  %v2019_v26 = vld [vmem:[%s3708_s1 + $0x18] sm:$0xff] }
 0x18c   :  { %v839_v28 = vadd.f32 %v838_v11, %v837_v33  ;;  %v110_v20 = vsub.f32 %v2017_v51, %v2234_v23  ;;  %v111_v33 = vsub.f32 %v2018_v1, %v2230_v22 }
 0x18d   :  { %v1614_v25 = vadd.f32 %v1613_v37, %v1612_v32  ;;  %v112_v32 = vsub.f32 %v2019_v26, %v2234_v23 }
 0x18e   :  { %v842_v27 = vcombine.low %v832_v30, %v839_v28  ;;  %v2020_v30 = vld [vmem:[%s3708_s1 + $0x20] sm:$0x1f]  ;;  %v1751_v28 = vsel %vm718_vm6, 1.0, %v2074_v38  ;;  %vm3722_vm6 = vcmp.gt.s32.totalorder %v2250_v53, 0 }
 0x18f   :  { %v1617_v56 = vcombine.low %v1607_v36, %v1614_v25  ;;  %v113_v11 = vsub.f32 %v2020_v30, %v2230_v22  ;;  %v2021_v36 = vld [vmem:[%s3708_s1 + $0x28] sm:$0x1f]  ;;  %v1752_v25 = vsel %vm719_vm9, 1.0, %v2074_v38  ;;  %v1754_v22 = vsel %vm721_vm14, 1.0, %v2074_v38  ;;  %s2077_s1 = smov [#allocation5]  }
 0x190   :  { %v849_v41 = vrot.slane %v842_v27, %v2220_v18  ;;  %v114_v37 = vsub.f32 %v2021_v36, %v2234_v23  ;;  %v1753_v27 = vsel %vm720_vm7, 1.0, %v2074_v38  ;;  %vm3723_vm14 = vcmp.gt.s32.totalorder %v2227_v42, 0  ;;  %s1676_s15 = sshll.u32 %s2077_s1, 4  ;;  %s1677_s15 = int_to_ptr.vmem [resolvable:$true] %s1676_s15 }
 0x191   :  { %v1624_v6 = vrot.slane %v1617_v56, %v2220_v18  ;;  %s2044_s3 = scalar_lea.vmem %s1677_s15, 128  ;;  %p2049_p9 = scmp.lt.s32.totalorder %s1677_s15, %s1677_s15 }
 0x192   :  { %v856_v8 = vrot.slane %v849_v41, %v2220_v18  ;;  %v1755_v41 = vsel %vm722_vm2, 1.0, %v2074_v38  ;;  %p2045_p8 = scmp.ne.s32.totalorder %s1677_s15, %s2044_s3  ;;  %p2050_p10 = scmp.lt.s32.totalorder %s2044_s3, %s2044_s3 }
 0x193   :  { %v1631_v35 = vrot.slane %v1624_v6, %v2220_v18  ;;  %v1756_v6 = vsel %vm723_vm10, 1.0, %v2074_v38 }
 0x194   :  { %v858_v17 = vmul.f32 %v3529_v14, %v856_v8  ;;  %p2051_p11 = por %p2050_p10, %p2049_p9 }
 0x195   :  { %v1633_v39 = vmul.f32 %v3514_v5, %v1631_v35  ;;  %v2008_v5 = vld [vmem:[%s3709_s2 + $0x2] sm:$0x3] }
 0x196   :  { %v863_v34 = vrot.slane %v858_v17, %v2237_v24  ;;  %v867_v45 = vrot.slane %v858_v17, %v2292_v31  ;;  %v1489_v0 = vrot.slane %v2008_v5, %v2237_v24  ;;  %v1493_v44 = vrot.slane %v2008_v5, %v2292_v31  ;;  %p2052_p12 = pnand %p2051_p11, %p2045_p8 }
 0x197   :  { %v1638_v49 = vrot.slane %v1633_v39, %v2237_v24  ;;  %v1642_v13 = vrot.slane %v1633_v39, %v2292_v31  ;;  %v736_v39 = vmul.f32 %v1751_v28, %v109_v12 }
 0x198   :  { %v870_v55 = vsel %vm129_vm12, %v863_v34, 0.0  ;;  %v871_v47 = vsel %vm129_vm12, %v867_v45, 0.0  ;;  %vm1494_vm0 = vcmp.eq.s32.totalorder %v2209_v9, %v1489_v0  ;;  %vm1495_vm5 = vcmp.eq.s32.totalorder %v2209_v9, %v1493_v44 }
 0x199   :  { %v872_v4 = vadd.f32 %v871_v47, %v870_v55  ;;  %v1645_v46 = vsel %vm129_vm12, %v1638_v49, 0.0  ;;  %v1646_v48 = vsel %vm129_vm12, %v1642_v13, 0.0  ;;  %vm1496_vm15 = vcmp.eq.s32.totalorder %v37_v43, %v1489_v0 }
 0x19a   :  { %v1647_v14 = vadd.f32 %v1646_v48, %v1645_v46  ;;  %vm1497_vm3 = vcmp.eq.s32.totalorder %v37_v43, %v1493_v44  ;;  %vm1498_vm11 = vcmp.eq.s32.totalorder %v38_v58, %v1489_v0  ;;  %vm1499_vm8 = vcmp.eq.s32.totalorder %v38_v58, %v1493_v44 }
 0x19b   :  { %873 = vadd.xlane.f32.xlu1 %v872_v4  ;;  %v1833_v16 = vsel %vm1494_vm0, 1.0, %v2074_v38  ;;  %v1834_v19 = vsel %vm1495_vm5, 1.0, %v2074_v38  ;;  %v1835_v56 = vsel %vm1496_vm15, 1.0, %v2074_v38  ;;  %v1836_v23 = vsel %vm1497_vm3, 1.0, %v2074_v38  ;;  %vm3721_vm0 = vmmov %vm3719_vm1 }
 0x19c   :  { %v1837_v9 = vsel %vm1498_vm11, 1.0, %v2074_v38  ;;  %v1838_v8 = vsel %vm1499_vm8, 1.0, %v2074_v38  ;;  %v1512_v35 = vmul.f32 %v1833_v16, %v950_v50  ;;  %v1513_v17 = vmul.f32 %v1834_v19, %v951_v63 }
 0x19d   :  { %v737_v34 = vmul.f32 %v1752_v25, %v110_v20  ;;  %v738_v45 = vmul.f32 %v1753_v27, %v111_v33  ;;  %v739_v49 = vmul.f32 %v1754_v22, %v112_v32  ;;  %v1514_v13 = vmul.f32 %v1835_v56, %v952_v3 }
 0x19e   :  { %v1515_v55 = vmul.f32 %v1836_v23, %v953_v52  ;;  %v740_v47 = vmul.f32 %v1755_v41, %v113_v11  ;;  %v741_v4 = vmul.f32 %v1756_v6, %v114_v37  ;;  %v1516_v46 = vmul.f32 %v1837_v9, %v954_v54 }
 0x19f   :  { %1648 = vadd.xlane.f32.xlu1 %v1647_v14  ;;  %v1517_v48 = vmul.f32 %v1838_v8, %v955_v10  ;;  %v742_v14 = vadd.f32 %v738_v45, %v736_v39  ;;  %v751_v5 = vadd.f32 %v739_v49, %v737_v34  ;;  %v1518_v43 = vadd.f32 %v1514_v13, %v1512_v35 }
 0x1a0   :  { %v1527_v0 = vadd.f32 %v1515_v55, %v1513_v17  ;;  %v743_v60 = vsel %vm3718_vm4, %v740_v47, 0.0  ;;  %v752_v44 = vsel %vm3719_vm1, %v741_v4, 0.0  ;;  %v1519_v58 = vsel %vm3720_vm13, %v1516_v46, 0.0 }
 0x1a1   :  { %v1528_v40 = vsel %vm3721_vm0, %v1517_v48, 0.0  ;;  %v744_v61 = vadd.f32 %v743_v60, %v742_v14  ;;  %v753_v62 = vadd.f32 %v752_v44, %v751_v5  ;;  %v1520_v50 = vadd.f32 %v1519_v58, %v1518_v43 }
 0x1a2   :  { %v1529_v57 = vadd.f32 %v1528_v40, %v1527_v0  ;;  %v2076_v34 = vmov 0  }
 0x1a3   :  { %v745_v63 = vrot.slane %v744_v61, 4  ;;  %v754_v59 = vrot.slane %v753_v62, 4  ;;  %v1521_v3 = vrot.slane %v1520_v50, 4 }
 0x1a4   :  { %v1530_v7 = vrot.slane %v1529_v57, 4 }
 0x1a5   :  { %v746_v52 = vadd.f32 %v745_v63, %v744_v61  ;;  %v755_v29 = vadd.f32 %v754_v59, %v753_v62  ;;  %v1522_v54 = vadd.f32 %v1521_v3, %v1520_v50 }
 0x1a6   :  { %v1531_v21 = vadd.f32 %v1530_v7, %v1529_v57 }
 0x1a7   :  { %v747_v10 = vrot.slane %v746_v52, 2  ;;  %v756_v16 = vrot.slane %v755_v29, 2  ;;  %v1523_v19 = vrot.slane %v1522_v54, 2 }
 0x1a8   :  { %v1532_v15 = vrot.slane %v1531_v21, 2 }
 0x1a9   :  { %v748_v12 = vadd.f32 %v747_v10, %v746_v52  ;;  %v757_v51 = vadd.f32 %v756_v16, %v755_v29  ;;  %v1524_v20 = vadd.f32 %v1523_v19, %v1522_v54 }
 0x1aa   :  { %v1533_v1 = vadd.f32 %v1532_v15, %v1531_v21 }
 0x1ab   :  { %v749_v33 = vrot.slane %v748_v12, 1  ;;  %v758_v26 = vrot.slane %v757_v51, 1  ;;  %v1525_v32 = vrot.slane %v1524_v20, 1 }
 0x1ac   :  { %v1534_v30 = vrot.slane %v1533_v1, 1 }
 0x1ad   :  { %v750_v11 = vadd.f32 %v749_v33, %v748_v12  ;;  %v759_v36 = vadd.f32 %v758_v26, %v757_v51  ;;  %v1526_v28 = vadd.f32 %v1525_v32, %v1524_v20  ;;  %v1653_v33 = vand.u32 127, %v35_v2 }
 0x1ae   :  { %v1535_v25 = vadd.f32 %v1534_v30, %v1533_v1 }
 0x1af   :  { %v760_v56 = vsub.f32 0.0, %v750_v11  ;;  %v761_v23 = vsub.f32 0.0, %v759_v36  ;;  %v1536_v6 = vsub.f32 0.0, %v1526_v28  ;;  %vm1656_vm10 = vcmp.eq.s32.totalorder %v1653_v33, 1 }
 0x1b0   :  { %v1537_v9 = vsub.f32 0.0, %v1535_v25  ;;  %vm1654_vm4 = vcmp.eq.s32.totalorder %v1653_v33, 0  ;;  %vm1659_vm1 = vcmp.eq.s32.totalorder %v1653_v33, 2 }
 0x1b1   :  { %v764_v39 = vcombine.low %v760_v56, %v761_v23 }
 0x1b2   :  { %v1540_v13 = vcombine.low %v1536_v6, %v1537_v9 }
 0x1b3   :  { %v771_v14 = vrot.slane %v764_v39, %v2220_v18 }
 0x1b4   :  { %v1547_v43 = vrot.slane %v1540_v13, %v2220_v18 }
 0x1b5   :  { %v778_v58 = vrot.slane %v771_v14, %v2220_v18 }
 0x1b6   :  { %v1554_v40 = vrot.slane %v1547_v43, %v2220_v18 }
 0x20a   :  { %v3657_v27 = vpop.xlane.xlu1 %973 }
 0x20b   :  { %v3655_v37 = vpop.xlane.xlu0 %133  ;;  %v975_v41 = vmul.f32 3.0, %v3657_v27 }
 0x20c   :  { %v135_v22 = vmul.f32 3.0, %v3655_v37  ;;  %v1651_v32 = vadd.f32 %v3657_v27, %v3655_v37 }
 0x20e   :  { %v1657_v28 = vsel %vm1656_vm10, %v1651_v32, 0.0 }
 0x228   :  { %v874_v1 = vpop.xlane.xlu1 %873 }
 0x22c   :  { %v1649_v26 = vpop.xlane.xlu1 %1648 }
 0x22d   :  { %v1650_v30 = vadd.f32 %v1649_v26, %v874_v1 }
 0x22f   :  { %v1655_v25 = vsel %vm1654_vm4, %v1650_v30, 0.0 }
 0x24e   :  { %v682_v8 = vpop.f32.mrb[0].mxu0 }
 0x24f   :  { %vm687_vm5 = vcmp.lt.f32.partialorder %v682_v8, %v135_v22  ;;  %v1458_v35 = vpop.f32.mrb[0].mxu1  ;;  %v684_v17 = vpop.f32.mrb[1].mxu0 }
 0x250   :  { %v689_v45 = vsel %vm687_vm5, 1, %v2076_v34  ;;  %vm1463_vm15 = vcmp.lt.f32.partialorder %v1458_v35, %v975_v41  ;;  %vm688_vm3 = vcmp.lt.f32.partialorder %v684_v17, %v135_v22  ;;  %v1460_v49 = vpop.f32.mrb[1].mxu1 }
 0x251   :  { %v1465_v55 = vsel %vm1463_vm15, 1, %v2076_v34  ;;  %v690_v47 = vsel %vm688_vm3, 1, %v2076_v34  ;;  %vm1464_vm11 = vcmp.lt.f32.partialorder %v1460_v49, %v975_v41  ;;  %v1658_v41 = vadd.f32 %v1657_v28, %v1655_v25 }
 0x252   :  { %v691_v4 = vcombine.low %v689_v45, %v690_v47  ;;  %v1466_v46 = vsel %vm1464_vm11, 1, %v2076_v34 }
 0x253   :  { %v1467_v48 = vcombine.low %v1465_v55, %v1466_v46 }
 0x254   :  { %v698_v5 = vrot.slane %v691_v4, %v2220_v18 }
 0x255   :  { %v1474_v0 = vrot.slane %v1467_v48, %v2220_v18 }
 0x256   :  { %v705_v60 = vrot.slane %v698_v5, %v2220_v18 }
 0x257   :  { %v1481_v44 = vrot.slane %v1474_v0, %v2220_v18 }
 0x258   :  { %vm706_vm8 = vcmp.ne.s32.totalorder %v705_v60, 0 }
 0x259   :  { %vm707_vm9 = vmor %vm3722_vm6, %vm706_vm8  ;;  %vm1482_vm7 = vcmp.ne.s32.totalorder %v1481_v44, 0 }
 0x25a   :  { %vm1483_vm2 = vmor %vm3723_vm14, %vm1482_vm7  ;;  %v1750_v61 = vsel %vm707_vm9, 1.0, %v2074_v38 }
 0x25b   :  { %v1832_v62 = vsel %vm1483_vm2, 1.0, %v2074_v38  ;;  %v780_v50 = vmul.f32 %v1750_v61, %v778_v58  ;;  %v802_v3 = vrot.slane %v1750_v61, %v2237_v24  ;;  %v806_v18 = vrot.slane %v1750_v61, %v2292_v31 }
 0x25c   :  { %v1556_v57 = vmul.f32 %v1832_v62, %v1554_v40  ;;  %v1578_v42 = vrot.slane %v1832_v62, %v2237_v24  ;;  %v1582_v52 = vrot.slane %v1832_v62, %v2292_v31 }
 0x25d   :  { %v785_v63 = vrot.slane %v780_v50, %v2237_v24  ;;  %v789_v59 = vrot.slane %v780_v50, %v2292_v31  ;;  %v809_v19 = vsel %vm129_vm12, %v802_v3, 0.0  ;;  %v810_v15 = vsel %vm129_vm12, %v806_v18, 0.0 }
 0x25e   :  { %v1561_v53 = vrot.slane %v1556_v57, %v2237_v24  ;;  %v1565_v7 = vrot.slane %v1556_v57, %v2292_v31  ;;  %v1585_v12 = vsel %vm129_vm12, %v1578_v42, 0.0  ;;  %v1586_v51 = vsel %vm129_vm12, %v1582_v52, 0.0 }
 0x25f   :  { %v792_v38 = vsel %vm129_vm12, %v785_v63, 0.0  ;;  %v793_v29 = vsel %vm129_vm12, %v789_v59, 0.0  ;;  %v811_v31 = vadd.f32 %v810_v15, %v809_v19  ;;  %v1587_v20 = vadd.f32 %v1586_v51, %v1585_v12 }
 0x260   :  { %v1568_v54 = vsel %vm129_vm12, %v1561_v53, 0.0  ;;  %v1569_v21 = vsel %vm129_vm12, %v1565_v7, 0.0  ;;  %v794_v10 = vadd.f32 %v793_v29, %v792_v38  ;;  %vm1662_vm12 = vcmp.eq.s32.totalorder %v1653_v33, 3 }
 0x261   :  { %v1570_v16 = vadd.f32 %v1569_v21, %v1568_v54 }
 0x262   :  { %795 = vadd.xlane.f32.xlu0 %v794_v10 }
 0x263   :  { %1571 = vadd.xlane.f32.xlu1 %v1570_v16 }
 0x266   :  { %812 = vadd.xlane.f32.xlu0 %v811_v31 }
 0x267   :  { %1588 = vadd.xlane.f32.xlu1 %v1587_v20 }
 0x2ef   :  { %v796_v11 = vpop.xlane.xlu0 %795 }
 0x2f0   :  { %v1572_v36 = vpop.xlane.xlu1 %1571 }
 0x2f1   :  { %v1573_v22 = vadd.f32 %v1572_v36, %v796_v11 }
 0x2f3   :  { %v1660_v56 = vsel %vm1659_vm1, %v1573_v22, 0.0  ;;  %v813_v23 = vpop.xlane.xlu0 %812 }
 0x2f4   :  { %v1589_v6 = vpop.xlane.xlu1 %1588  ;;  %v1661_v2 = vadd.f32 %v1660_v56, %v1658_v41 }
 0x2f5   :  { %v1590_v9 = vadd.f32 %v1589_v6, %v813_v23 }
 0x2f7   :  { %v1663_v8 = vsel %vm1662_vm12, %v1590_v9, 0.0 }
 0x2f8   :  { %v1664_v37 = vadd.f32 %v1663_v8, %v1661_v2 }
 0x2fa   :  { %v1668_v27 = vrot.slane %v1664_v37, %v2237_v24 }
 0x2fc   :  { %1669 = vst [vmem:[#allocation5] sm:$0xff] %v1668_v27 }
 0x2fd   :  { %2055 = shalt.err (!%p2052_p12)
}
 0x2fe   :  { %s2056_s17 = scalar_lea.hbm %s3712_s5, 128 }
 0x2ff   :  { %p2057_p13 = scmp.ne.s32.totalorder %s3712_s5, %s2056_s17  ;;  %p2060_p0 = scmp.lt.u32.totalorder %s2056_s17, %s3712_s5 }
 0x301   :  { %p2062_p1 = pnand %p2060_p0, %p2057_p13 }
 0x303   :  { %2065 = shalt.err (!%p2062_p1)
}
 0x304   :  { %1679 = dma.vmem_to_hbm [thread:$0]  %s1677_s15, 128, %s3712_s5, [#allocation4]  }
 0x305   :  { %2068 = dma.done.wait [#allocation4], 128  }
 0x306   :  { %2069 = vsyncadd [#allocation4], 4294967168 }
 0x307   :  { %1683 = vsyncpa [#allocation3], 1 }
 0x308   :  { %1684 = vsyncpa [#allocation4], 1 }

</bundles_post_ra>
